<compile_context>
chip_gen: v5e
topology: v5e:2x2
jax: 0.10.0
libtpu: 0.0.40
codegen_flags: <defaults>
</compile_context>

<pallas_src>
import functools

import jax
import jax.numpy as jnp
from jax.experimental import pallas as pl
from jax.experimental.pallas import tpu as pltpu


_LAYER_PARAMS = ('wqkv', 'bqkv', 'wo', 'bo', 'g1', 'be1',
                 'w1', 'b1', 'w2', 'b2', 'g2', 'be2')
_BF16_PARAMS = frozenset({'wqkv', 'wo', 'w1', 'w2'})
# TODO(synk): on v7x, quantize wqkv/wo/w1/w2 to fp8 (per-tensor scales, f32
# accumulation) to halve weight HBM traffic again; needs calibration.


def _layernorm(t, g, b, eps):
    mu = jnp.mean(t, axis=-1, keepdims=True)
    var = jnp.mean((t - mu) ** 2, axis=-1, keepdims=True)
    return (t - mu) * jax.lax.rsqrt(var + jnp.float32(eps)) * g + b


def encoder_stack_kernel(x_ref, kbias_ref,
                         wqkv_ref, bqkv_ref, wo_ref, bo_ref,
                         g1_ref, be1_ref, w1_ref, b1_ref, w2_ref, b2_ref,
                         g2_ref, be2_ref,
                         o_ref, *, heads, eps):
    """One encoder layer per grid step; grid = (batch_tiles, layers)."""
    layer = pl.program_id(1)
    bt, S, D = x_ref.shape
    H = heads
    dh = D // H
    M = bt * S                              # batch folded into the matmul M dim
    scale = jnp.float32(1.0 / (dh ** 0.5))

    # Layer 0: seed the VMEM-resident carry (the output block) from HBM.  The
    # output BlockSpec returns the same block for every layer, so o_ref stays
    # in VMEM across the whole layer sweep and is written back to HBM once per
    # batch tile.  No acc scratch, no per-layer dtype casts or extra stores.
    @pl.when(layer == 0)
    def _():
        o_ref[...] = x_ref[...].astype(jnp.float32)

    x = o_ref[...].reshape(M, D)            # (M, D) f32 running activation
    x_bf = x.astype(jnp.bfloat16)

    # --- Fused Q/K/V projection: one MXU pass, lane-dense 3*D output -------
    qkv = jnp.dot(x_bf, wqkv_ref[0],
                  preferred_element_type=jnp.float32) + bqkv_ref[0]   # (M, 3D)

    def heads_major(t2d):
        # (M, D) -> (bt*H, S, dh): one head-major relayout per tensor.  At
        # dh < 128 this S<->H exchange is unavoidable without a hand-rolled
        # per-head MXU pipeline; everything downstream then runs with a single
        # leading batch axis and no further transposes/concatenates.
        return (t2d.reshape(bt, S, H, dh)
                    .transpose(0, 2, 1, 3)
                    .reshape(bt * H, S, dh))

    q = heads_major(qkv[:, :D]).astype(jnp.bfloat16)
    k = heads_major(qkv[:, D:2 * D]).astype(jnp.bfloat16)
    v = heads_major(qkv[:, 2 * D:]).astype(jnp.bfloat16)

    # Compact key-padding bias (bt, 1, S) -> broadcast over heads & queries.
    kb = jnp.broadcast_to(kbias_ref[...], (bt, H, S)).reshape(bt * H, 1, S)

    # --- Attention (batched over bt*H; f32 softmax) -------------------------
    # TODO(synk): for realistic S, add flash-style KV/query tiling with an
    # online softmax instead of materializing the (bt*H, S, S) score tensor.
    s = jnp.einsum('bqd,bkd->bqk', q, k,
                   preferred_element_type=jnp.float32) * scale
    s = s + kb
    s = s - jnp.max(s, axis=-1, keepdims=True)
    p = jnp.exp(s)
    p = p * pl.reciprocal(jnp.sum(p, axis=-1, keepdims=True), approx=True)

    ctx = jnp.einsum('bqk,bkd->bqd', p.astype(jnp.bfloat16), v,
                     preferred_element_type=jnp.float32)       # (bt*H, S, dh)
    ctx = (ctx.reshape(bt, H, S, dh)
              .transpose(0, 2, 1, 3)
              .reshape(M, D))                                  # merge heads
    attn = jnp.dot(ctx.astype(jnp.bfloat16), wo_ref[0],
                   preferred_element_type=jnp.float32) + bo_ref[0]

    # TODO(synk): dropout omitted — deterministic forward (inference mode).

    # --- Residual + LayerNorm 1 (f32 elementwise) ---------------------------
    y = _layernorm(x + attn, g1_ref[0], be1_ref[0], eps)

    # --- Feed-forward (ReLU), M = bt*S rows through the MXU -----------------
    # TODO(synk): at D=1024/d_ff=4096-class sizes on v7x (64 MiB VMEM), add a
    # d_ff K-tiling grid axis for w1/w2 so per-layer weight blocks stay small
    # enough to double-buffer.
    h1 = jnp.dot(y.astype(jnp.bfloat16), w1_ref[0],
                 preferred_element_type=jnp.float32) + b1_ref[0]
    h1 = jnp.maximum(h1, 0.0)
    ff = jnp.dot(h1.astype(jnp.bfloat16), w2_ref[0],
                 preferred_element_type=jnp.float32) + b2_ref[0]

    # --- Residual + LayerNorm 2 ---------------------------------------------
    z = _layernorm(y + ff, g2_ref[0], be2_ref[0], eps)

    o_ref[...] = z.reshape(bt, S, D)        # carry to next layer / final value


def _pick_batch_tile(batch, seq, target_m=512):
    """Largest divisor of `batch` keeping batch_tile*seq near the MXU target M.

    v6e wants M ~ 640+, v7x ~ 310+, v5e ~ 240+ to be MXU-bound on the streamed
    weights; 512 is a reasonable shared target.  (On v7x also prefer keeping
    >= 2 batch tiles when the batch allows it, so both TensorCores get work.)
    """
    want = max(1, -(-target_m // seq))      # ceil(target_m / seq)
    bt = 1
    for cand in range(1, batch + 1):
        if batch % cand == 0 and cand <= want:
            bt = cand
    return bt


def encoder_forward(x, key_padding_mask, layer_params, *, heads, eps,
                    batch_tile=None, vmem_limit_bytes=64 * 1024 * 1024):
    """Equivalent of Encoder.forward: all layers fused into one pallas_call.

    key_padding_mask: (B, S) with 1.0 = attend to this key, 0.0 = masked; or
    None.  (General dense (B, S, S) masks would need the dense-bias path.)
    """
    B, S, D = x.shape
    L = len(layer_params)

    if batch_tile is None:
        batch_tile = _pick_batch_tile(B, S)
    assert B % batch_tile == 0, "batch_tile must divide batch"
    n_btiles = B // batch_tile

    # One-time wrapper-side param prep: fuse Q/K/V, stack per-layer params
    # along a leading layer axis, cast matmul weights to bf16 (f32 MXU accum).
    fused_layers = []
    for lp in layer_params:
        fused_layers.append({
            'wqkv': jnp.concatenate([lp['wq'], lp['wk'], lp['wv']], axis=1),
            'bqkv': jnp.concatenate([lp['bq'], lp['bk'], lp['bv']], axis=1),
            'wo': lp['wo'], 'bo': lp['bo'],
            'g1': lp['g1'], 'be1': lp['be1'],
            'w1': lp['w1'], 'b1': lp['b1'],
            'w2': lp['w2'], 'b2': lp['b2'],
            'g2': lp['g2'], 'be2': lp['be2'],
        })
    stacked = {}
    for name in _LAYER_PARAMS:
        p = jnp.stack([fl[name] for fl in fused_layers], axis=0)
        if name in _BF16_PARAMS:
            p = p.astype(jnp.bfloat16)      # halves weight DMA / VMEM
        stacked[name] = p

    # Compact additive key-padding bias: (B, 1, S); 0 = attend, -1e9 = masked.
    if key_padding_mask is None:
        kbias = jnp.zeros((B, 1, S), jnp.float32)
    else:
        m = key_padding_mask.astype(jnp.float32).reshape(B, 1, S)
        kbias = (m - 1.0) * jnp.float32(1e9)

    act_spec = pl.BlockSpec((batch_tile, S, D), lambda b, l: (b, 0, 0))

    def layer_spec(shape):
        nz = len(shape) - 1
        return pl.BlockSpec((1,) + tuple(shape[1:]),
                            lambda b, l, _nz=nz: (l,) + (0,) * _nz)

    in_specs = [
        act_spec,                                             # x (seed, layer 0)
        pl.BlockSpec((batch_tile, 1, S), lambda b, l: (b, 0, 0)),  # key bias
    ] + [layer_spec(stacked[name].shape) for name in _LAYER_PARAMS]

    kernel = functools.partial(encoder_stack_kernel, heads=heads, eps=eps)
    return pl.pallas_call(
        kernel,
        out_shape=jax.ShapeDtypeStruct((B, S, D), jnp.float32),
        grid=(n_btiles, L),
        in_specs=in_specs,
        out_specs=act_spec,
        compiler_params=pltpu.CompilerParams(
            dimension_semantics=("parallel", "arbitrary"),
            vmem_limit_bytes=vmem_limit_bytes),
    )(x, kbias, *[stacked[name] for name in _LAYER_PARAMS])
    # TODO(synk): pad D to a multiple of 128 (lane-dense stores / full MXU
    # columns) for production configs where d_model is not already aligned.


# --------------------------- pure-JAX reference -----------------------------

def _ln_ref(t, g, b, eps):
    mu = jnp.mean(t, axis=-1, keepdims=True)
    var = jnp.mean((t - mu) ** 2, axis=-1, keepdims=True)
    return (t - mu) * jax.lax.rsqrt(var + eps) * g + b


def encoder_reference(x, key_padding_mask, layer_params, *, heads, eps):
    B, S, D = x.shape
    H, dh = heads, D // heads
    if key_padding_mask is None:
        bias = jnp.zeros((B, 1, 1, S), jnp.float32)
    else:
        bias = (key_padding_mask.astype(jnp.float32).reshape(B, 1, 1, S)
                - 1.0) * 1e9
    h = x.astype(jnp.float32)
    for lp in layer_params:
        q = h @ lp['wq'] + lp['bq']
        k = h @ lp['wk'] + lp['bk']
        v = h @ lp['wv'] + lp['bv']
        split = lambda t: t.reshape(B, S, H, dh).transpose(0, 2, 1, 3)
        qh, kh, vh = split(q), split(k), split(v)
        s = jnp.einsum('bhqd,bhkd->bhqk', qh, kh) * (1.0 / (dh ** 0.5)) + bias
        p = jax.nn.softmax(s, axis=-1)
        ctx = jnp.einsum('bhqk,bhkd->bhqd', p, vh)
        ctx = ctx.transpose(0, 2, 1, 3).reshape(B, S, D)
        attn = ctx @ lp['wo'] + lp['bo']
        y = _ln_ref(h + attn, lp['g1'], lp['be1'], eps)
        ff = jnp.maximum(y @ lp['w1'] + lp['b1'], 0.0) @ lp['w2'] + lp['b2']
        h = _ln_ref(y + ff, lp['g2'], lp['be2'], eps)
    return h


def init_layer_params(key, d_model, d_ff):
    ks = jax.random.split(key, 6)
    s = 0.02
    f32 = jnp.float32
    return {
        'wq': s * jax.random.normal(ks[0], (d_model, d_model), f32),
        'bq': jnp.zeros((1, d_model), f32),
        'wk': s * jax.random.normal(ks[1], (d_model, d_model), f32),
        'bk': jnp.zeros((1, d_model), f32),
        'wv': s * jax.random.normal(ks[2], (d_model, d_model), f32),
        'bv': jnp.zeros((1, d_model), f32),
        'wo': s * jax.random.normal(ks[3], (d_model, d_model), f32),
        'bo': jnp.zeros((1, d_model), f32),
        'g1': jnp.ones((1, d_model), f32),
        'be1': jnp.zeros((1, d_model), f32),
        'w1': s * jax.random.normal(ks[4], (d_model, d_ff), f32),
        'b1': jnp.zeros((1, d_ff), f32),
        'w2': s * jax.random.normal(ks[5], (d_ff, d_model), f32),
        'b2': jnp.zeros((1, d_model), f32),
        'g2': jnp.ones((1, d_model), f32),
        'be2': jnp.zeros((1, d_model), f32),
    }


if __name__ == "__main__":
    # Encoder(n=2, d_model=32, heads=4, d_ff=64, dropout_rate=0.1, eps=1e-5,
    #         activation=ReLU) — inference forward.
    n_layers, d_model, heads, d_ff, eps = 2, 32, 4, 64, 1e-5
    B, S = 2, 8

    key = jax.random.PRNGKey(0)
    kx, kp = jax.random.split(key)
    x = jax.random.normal(kx, (B, S, d_model), jnp.float32)

    # Key-padding mask: 1 = attend, 0 = masked; batch 1 has its last 2 key
    # positions padded out (same semantics as masked_fill(mask == 0, -1e9)).
    key_padding_mask = jnp.ones((B, S), jnp.float32).at[1, 6:].set(0.0)

    layer_keys = jax.random.split(kp, n_layers)
    layer_params = [init_layer_params(k, d_model, d_ff) for k in layer_keys]

    out = encoder_forward(x, key_padding_mask, layer_params,
                          heads=heads, eps=eps)
    out = jax.block_until_ready(out)

    assert out.shape == (B, S, d_model)
    assert bool(jnp.all(jnp.isfinite(out)))

    # Loose tolerance: kernel uses bf16 matmul operands + approx reciprocal.
    ref = encoder_reference(x, key_padding_mask, layer_params,
                            heads=heads, eps=eps)
    max_err = float(jnp.max(jnp.abs(out - ref)))
    assert max_err < 5e-2, f"mismatch vs reference: {max_err}"

    print("KERNEL_OK")
</pallas_src>

<mosaic_0001>
module attributes {stable_mosaic.version = 11 : i64} {
  func.func @encoder_stack_kernel(%arg0: i32, %arg1: i32, %arg2: memref<2x8x32xf32, #tpu.memory_space<vmem>>, %arg3: memref<2x1x8xf32, #tpu.memory_space<vmem>>, %arg4: memref<1x32x96xbf16, #tpu.memory_space<vmem>>, %arg5: memref<1x1x96xf32, #tpu.memory_space<vmem>>, %arg6: memref<1x32x32xbf16, #tpu.memory_space<vmem>>, %arg7: memref<1x1x32xf32, #tpu.memory_space<vmem>>, %arg8: memref<1x1x32xf32, #tpu.memory_space<vmem>>, %arg9: memref<1x1x32xf32, #tpu.memory_space<vmem>>, %arg10: memref<1x32x64xbf16, #tpu.memory_space<vmem>>, %arg11: memref<1x1x64xf32, #tpu.memory_space<vmem>>, %arg12: memref<1x64x32xbf16, #tpu.memory_space<vmem>>, %arg13: memref<1x1x32xf32, #tpu.memory_space<vmem>>, %arg14: memref<1x1x32xf32, #tpu.memory_space<vmem>>, %arg15: memref<1x1x32xf32, #tpu.memory_space<vmem>>, %arg16: memref<2x8x32xf32, #tpu.memory_space<vmem>>) attributes {dimension_semantics = [#tpu.dimension_semantics<parallel>, #tpu.dimension_semantics<arbitrary>], iteration_bounds = array<i64: 1, 2>, scalar_prefetch = 0 : i64, scratch_operands = 0 : i64, tpu.core_type = #tpu.core_type<tc>, window_params = [{transform_indices = @transform_0, window_bounds = array<i64: 2, 8, 32>}, {transform_indices = @transform_1, window_bounds = array<i64: 2, 1, 8>}, {transform_indices = @transform_2, window_bounds = array<i64: 1, 32, 96>}, {transform_indices = @transform_3, window_bounds = array<i64: 1, 1, 96>}, {transform_indices = @transform_4, window_bounds = array<i64: 1, 32, 32>}, {transform_indices = @transform_5, window_bounds = array<i64: 1, 1, 32>}, {transform_indices = @transform_6, window_bounds = array<i64: 1, 1, 32>}, {transform_indices = @transform_7, window_bounds = array<i64: 1, 1, 32>}, {transform_indices = @transform_8, window_bounds = array<i64: 1, 32, 64>}, {transform_indices = @transform_9, window_bounds = array<i64: 1, 1, 64>}, {transform_indices = @transform_10, window_bounds = array<i64: 1, 64, 32>}, {transform_indices = @transform_11, window_bounds = array<i64: 1, 1, 32>}, {transform_indices = @transform_12, window_bounds = array<i64: 1, 1, 32>}, {transform_indices = @transform_13, window_bounds = array<i64: 1, 1, 32>}, {transform_indices = @transform_14, window_bounds = array<i64: 2, 8, 32>}]} {
    %c0_i32 = arith.constant 0 : i32
    %0 = arith.cmpi eq, %arg1, %c0_i32 : i32
    %1 = arith.extui %0 : i1 to i32
    %c0_i32_0 = arith.constant 0 : i32
    %2 = arith.cmpi ne, %1, %c0_i32_0 : i32
    scf.if %2 {
      %c0_64 = arith.constant 0 : index
      %c0_65 = arith.constant 0 : index
      %c0_66 = arith.constant 0 : index
      %134 = vector.load %arg2[%c0_64, %c0_65, %c0_66] : memref<2x8x32xf32, #tpu.memory_space<vmem>>, vector<2x8x32xf32>
      %c0_67 = arith.constant 0 : index
      %c0_68 = arith.constant 0 : index
      %c0_69 = arith.constant 0 : index
      %135 = vector.load %arg16[%c0_67, %c0_68, %c0_69] : memref<2x8x32xf32, #tpu.memory_space<vmem>>, vector<2x8x32xf32>
      tpu.vector_store %arg16[%c0_67, %c0_68, %c0_69], %134 {strides = array<i32>} : memref<2x8x32xf32, #tpu.memory_space<vmem>>, vector<2x8x32xf32>,
    } else {
    }
    %c0 = arith.constant 0 : index
    %c0_1 = arith.constant 0 : index
    %c0_2 = arith.constant 0 : index
    %3 = vector.load %arg16[%c0, %c0_1, %c0_2] : memref<2x8x32xf32, #tpu.memory_space<vmem>>, vector<2x8x32xf32>
    %4 = vector.shape_cast %3 : vector<2x8x32xf32> to vector<16x32xf32>
    %5 = arith.truncf %4 : vector<16x32xf32> to vector<16x32xbf16>
    %c0_3 = arith.constant 0 : index
    %c0_4 = arith.constant 0 : index
    %c0_5 = arith.constant 0 : index
    %6 = vector.load %arg4[%c0_3, %c0_4, %c0_5] : memref<1x32x96xbf16, #tpu.memory_space<vmem>>, vector<1x32x96xbf16>
    %7 = vector.shape_cast %6 : vector<1x32x96xbf16> to vector<32x96xbf16>
    %cst = arith.constant dense<0.000000e+00> : vector<16x96xf32>
    %8 = tpu.matmul %5, %7, %cst {dimension_numbers = #tpu.dot_dimension_numbers<[1], [0], [0], [1], [0, 0, 1, 1], [], []>} : vector<16x32xbf16>, vector<32x96xbf16>, vector<16x96xf32> -> vector<16x96xf32>
    %c0_6 = arith.constant 0 : index
    %c0_7 = arith.constant 0 : index
    %c0_8 = arith.constant 0 : index
    %9 = vector.load %arg5[%c0_6, %c0_7, %c0_8] : memref<1x1x96xf32, #tpu.memory_space<vmem>>, vector<1x1x96xf32>
    %10 = vector.shape_cast %9 : vector<1x1x96xf32> to vector<1x96xf32>
    %11 = vector.broadcast %10 : vector<1x96xf32> to vector<16x96xf32>
    %12 = arith.addf %8, %11 : vector<16x96xf32>
    %13 = vector.extract_strided_slice %12 {offsets = [0, 0], sizes = [16, 32], strides = [1, 1]} : vector<16x96xf32> to vector<16x32xf32>
    %14 = vector.shape_cast %13 : vector<16x32xf32> to vector<2x8x4x8xf32>
    %15 = tpu.transpose %14, [0, 2, 1, 3] : vector<2x8x4x8xf32> -> vector<2x4x8x8xf32>
    %16 = vector.shape_cast %15 : vector<2x4x8x8xf32> to vector<8x8x8xf32>
    %17 = arith.truncf %16 : vector<8x8x8xf32> to vector<8x8x8xbf16>
    %18 = vector.extract_strided_slice %12 {offsets = [0, 32], sizes = [16, 32], strides = [1, 1]} : vector<16x96xf32> to vector<16x32xf32>
    %19 = vector.shape_cast %18 : vector<16x32xf32> to vector<2x8x4x8xf32>
    %20 = tpu.transpose %19, [0, 2, 1, 3] : vector<2x8x4x8xf32> -> vector<2x4x8x8xf32>
    %21 = vector.shape_cast %20 : vector<2x4x8x8xf32> to vector<8x8x8xf32>
    %22 = arith.truncf %21 : vector<8x8x8xf32> to vector<8x8x8xbf16>
    %23 = vector.extract_strided_slice %12 {offsets = [0, 64], sizes = [16, 32], strides = [1, 1]} : vector<16x96xf32> to vector<16x32xf32>
    %24 = vector.shape_cast %23 : vector<16x32xf32> to vector<2x8x4x8xf32>
    %25 = tpu.transpose %24, [0, 2, 1, 3] : vector<2x8x4x8xf32> -> vector<2x4x8x8xf32>
    %26 = vector.shape_cast %25 : vector<2x4x8x8xf32> to vector<8x8x8xf32>
    %27 = arith.truncf %26 : vector<8x8x8xf32> to vector<8x8x8xbf16>
    %c0_9 = arith.constant 0 : index
    %c0_10 = arith.constant 0 : index
    %c0_11 = arith.constant 0 : index
    %28 = vector.load %arg3[%c0_9, %c0_10, %c0_11] : memref<2x1x8xf32, #tpu.memory_space<vmem>>, vector<2x1x8xf32>
    %29 = vector.shape_cast %28 : vector<2x1x8xf32> to vector<2x1x8xf32>
    %30 = vector.broadcast %29 : vector<2x1x8xf32> to vector<2x4x8xf32>
    %31 = vector.shape_cast %30 : vector<2x4x8xf32> to vector<8x1x8xf32>
    "tpu.trace_start"() <{level = 10 : i32, message = "bqd,bkd->bqk"}> : () -> ()
    %cst_12 = arith.constant dense<0.000000e+00> : vector<8x8x8xf32>
    %32 = tpu.matmul %17, %22, %cst_12 {dimension_numbers = #tpu.dot_dimension_numbers<[2], [2], [1], [1], [0, 0, 0, 1, 1, 1], [0], [0]>} : vector<8x8x8xbf16>, vector<8x8x8xbf16>, vector<8x8x8xf32> -> vector<8x8x8xf32>
    "tpu.trace_stop"() : () -> ()
    %cst_13 = arith.constant 0.353553385 : f32
    %33 = vector.broadcast %cst_13 : f32 to vector<8x8x8xf32>
    %34 = arith.mulf %32, %33 : vector<8x8x8xf32>
    %35 = vector.broadcast %31 : vector<8x1x8xf32> to vector<8x8x8xf32>
    %36 = arith.addf %34, %35 : vector<8x8x8xf32>
    %cst_14 = arith.constant dense<0xFF800000> : vector<8x8xf32>
    %37 = vector.multi_reduction <maximumf>, %36, %cst_14 [2] : vector<8x8x8xf32> to vector<8x8xf32>
    %38 = vector.shape_cast %37 : vector<8x8xf32> to vector<8x8x1xf32>
    %39 = vector.broadcast %38 : vector<8x8x1xf32> to vector<8x8x8xf32>
    %40 = arith.subf %36, %39 : vector<8x8x8xf32>
    %41 = math.exp %40 : vector<8x8x8xf32>
    %cst_15 = arith.constant dense<0.000000e+00> : vector<8x8xf32>
    %42 = vector.multi_reduction <add>, %41, %cst_15 [2] : vector<8x8x8xf32> to vector<8x8xf32>
    %43 = vector.shape_cast %42 : vector<8x8xf32> to vector<8x8x1xf32>
    %44 = tpu.reciprocal %43 {approx = true} : vector<8x8x1xf32> -> vector<8x8x1xf32>
    %45 = vector.broadcast %44 : vector<8x8x1xf32> to vector<8x8x8xf32>
    %46 = arith.mulf %41, %45 : vector<8x8x8xf32>
    %47 = arith.truncf %46 : vector<8x8x8xf32> to vector<8x8x8xbf16>
    "tpu.trace_start"() <{level = 10 : i32, message = "bqk,bkd->bqd"}> : () -> ()
    %cst_16 = arith.constant dense<0.000000e+00> : vector<8x8x8xf32>
    %48 = tpu.matmul %47, %27, %cst_16 {dimension_numbers = #tpu.dot_dimension_numbers<[2], [1], [1], [2], [0, 0, 0, 1, 1, 2], [0], [0]>} : vector<8x8x8xbf16>, vector<8x8x8xbf16>, vector<8x8x8xf32> -> vector<8x8x8xf32>
    "tpu.trace_stop"() : () -> ()
    %49 = vector.shape_cast %48 : vector<8x8x8xf32> to vector<2x4x8x8xf32>
    %50 = tpu.transpose %49, [0, 2, 1, 3] : vector<2x4x8x8xf32> -> vector<2x8x4x8xf32>
    %51 = vector.shape_cast %50 : vector<2x8x4x8xf32> to vector<16x32xf32>
    %52 = arith.truncf %51 : vector<16x32xf32> to vector<16x32xbf16>
    %c0_17 = arith.constant 0 : index
    %c0_18 = arith.constant 0 : index
    %c0_19 = arith.constant 0 : index
    %53 = vector.load %arg6[%c0_17, %c0_18, %c0_19] : memref<1x32x32xbf16, #tpu.memory_space<vmem>>, vector<1x32x32xbf16>
    %54 = vector.shape_cast %53 : vector<1x32x32xbf16> to vector<32x32xbf16>
    %cst_20 = arith.constant dense<0.000000e+00> : vector<16x32xf32>
    %55 = tpu.matmul %52, %54, %cst_20 {dimension_numbers = #tpu.dot_dimension_numbers<[1], [0], [0], [1], [0, 0, 1, 1], [], []>} : vector<16x32xbf16>, vector<32x32xbf16>, vector<16x32xf32> -> vector<16x32xf32>
    %c0_21 = arith.constant 0 : index
    %c0_22 = arith.constant 0 : index
    %c0_23 = arith.constant 0 : index
    %56 = vector.load %arg7[%c0_21, %c0_22, %c0_23] : memref<1x1x32xf32, #tpu.memory_space<vmem>>, vector<1x1x32xf32>
    %57 = vector.shape_cast %56 : vector<1x1x32xf32> to vector<1x32xf32>
    %58 = vector.broadcast %57 : vector<1x32xf32> to vector<16x32xf32>
    %59 = arith.addf %55, %58 : vector<16x32xf32>
    %60 = arith.addf %4, %59 : vector<16x32xf32>
    %c0_24 = arith.constant 0 : index
    %c0_25 = arith.constant 0 : index
    %c0_26 = arith.constant 0 : index
    %61 = vector.load %arg8[%c0_24, %c0_25, %c0_26] : memref<1x1x32xf32, #tpu.memory_space<vmem>>, vector<1x1x32xf32>
    %62 = vector.shape_cast %61 : vector<1x1x32xf32> to vector<1x32xf32>
    %c0_27 = arith.constant 0 : index
    %c0_28 = arith.constant 0 : index
    %c0_29 = arith.constant 0 : index
    %63 = vector.load %arg9[%c0_27, %c0_28, %c0_29] : memref<1x1x32xf32, #tpu.memory_space<vmem>>, vector<1x1x32xf32>
    %64 = vector.shape_cast %63 : vector<1x1x32xf32> to vector<1x32xf32>
    %cst_30 = arith.constant dense<0.000000e+00> : vector<16xf32>
    %65 = vector.multi_reduction <add>, %60, %cst_30 [1] : vector<16x32xf32> to vector<16xf32>
    %66 = vector.shape_cast %65 : vector<16xf32> to vector<16x1xf32>
    %cst_31 = arith.constant 3.200000e+01 : f32
    %67 = vector.broadcast %cst_31 : f32 to vector<16x1xf32>
    %68 = arith.divf %66, %67 : vector<16x1xf32>
    %69 = vector.broadcast %68 : vector<16x1xf32> to vector<16x32xf32>
    %70 = arith.subf %60, %69 : vector<16x32xf32>
    %71 = arith.mulf %70, %70 : vector<16x32xf32>
    %cst_32 = arith.constant dense<0.000000e+00> : vector<16xf32>
    %72 = vector.multi_reduction <add>, %71, %cst_32 [1] : vector<16x32xf32> to vector<16xf32>
    %73 = vector.shape_cast %72 : vector<16xf32> to vector<16x1xf32>
    %cst_33 = arith.constant 3.200000e+01 : f32
    %74 = vector.broadcast %cst_33 : f32 to vector<16x1xf32>
    %75 = arith.divf %73, %74 : vector<16x1xf32>
    %76 = vector.broadcast %68 : vector<16x1xf32> to vector<16x32xf32>
    %77 = arith.subf %60, %76 : vector<16x32xf32>
    %cst_34 = arith.constant 9.99999974E-6 : f32
    %78 = vector.broadcast %cst_34 : f32 to vector<16x1xf32>
    %79 = arith.addf %75, %78 : vector<16x1xf32>
    %80 = math.rsqrt %79 : vector<16x1xf32>
    %81 = vector.broadcast %80 : vector<16x1xf32> to vector<16x32xf32>
    %82 = arith.mulf %77, %81 : vector<16x32xf32>
    %83 = vector.broadcast %62 : vector<1x32xf32> to vector<16x32xf32>
    %84 = arith.mulf %82, %83 : vector<16x32xf32>
    %85 = vector.broadcast %64 : vector<1x32xf32> to vector<16x32xf32>
    %86 = arith.addf %84, %85 : vector<16x32xf32>
    %87 = arith.truncf %86 : vector<16x32xf32> to vector<16x32xbf16>
    %c0_35 = arith.constant 0 : index
    %c0_36 = arith.constant 0 : index
    %c0_37 = arith.constant 0 : index
    %88 = vector.load %arg10[%c0_35, %c0_36, %c0_37] : memref<1x32x64xbf16, #tpu.memory_space<vmem>>, vector<1x32x64xbf16>
    %89 = vector.shape_cast %88 : vector<1x32x64xbf16> to vector<32x64xbf16>
    %cst_38 = arith.constant dense<0.000000e+00> : vector<16x64xf32>
    %90 = tpu.matmul %87, %89, %cst_38 {dimension_numbers = #tpu.dot_dimension_numbers<[1], [0], [0], [1], [0, 0, 1, 1], [], []>} : vector<16x32xbf16>, vector<32x64xbf16>, vector<16x64xf32> -> vector<16x64xf32>
    %c0_39 = arith.constant 0 : index
    %c0_40 = arith.constant 0 : index
    %c0_41 = arith.constant 0 : index
    %91 = vector.load %arg11[%c0_39, %c0_40, %c0_41] : memref<1x1x64xf32, #tpu.memory_space<vmem>>, vector<1x1x64xf32>
    %92 = vector.shape_cast %91 : vector<1x1x64xf32> to vector<1x64xf32>
    %93 = vector.broadcast %92 : vector<1x64xf32> to vector<16x64xf32>
    %94 = arith.addf %90, %93 : vector<16x64xf32>
    %cst_42 = arith.constant 0.000000e+00 : f32
    %95 = vector.broadcast %cst_42 : f32 to vector<16x64xf32>
    %96 = arith.maximumf %94, %95 : vector<16x64xf32>
    %97 = arith.truncf %96 : vector<16x64xf32> to vector<16x64xbf16>
    %c0_43 = arith.constant 0 : index
    %c0_44 = arith.constant 0 : index
    %c0_45 = arith.constant 0 : index
    %98 = vector.load %arg12[%c0_43, %c0_44, %c0_45] : memref<1x64x32xbf16, #tpu.memory_space<vmem>>, vector<1x64x32xbf16>
    %99 = vector.shape_cast %98 : vector<1x64x32xbf16> to vector<64x32xbf16>
    %cst_46 = arith.constant dense<0.000000e+00> : vector<16x32xf32>
    %100 = tpu.matmul %97, %99, %cst_46 {dimension_numbers = #tpu.dot_dimension_numbers<[1], [0], [0], [1], [0, 0, 1, 1], [], []>} : vector<16x64xbf16>, vector<64x32xbf16>, vector<16x32xf32> -> vector<16x32xf32>
    %c0_47 = arith.constant 0 : index
    %c0_48 = arith.constant 0 : index
    %c0_49 = arith.constant 0 : index
    %101 = vector.load %arg13[%c0_47, %c0_48, %c0_49] : memref<1x1x32xf32, #tpu.memory_space<vmem>>, vector<1x1x32xf32>
    %102 = vector.shape_cast %101 : vector<1x1x32xf32> to vector<1x32xf32>
    %103 = vector.broadcast %102 : vector<1x32xf32> to vector<16x32xf32>
    %104 = arith.addf %100, %103 : vector<16x32xf32>
    %105 = arith.addf %86, %104 : vector<16x32xf32>
    %c0_50 = arith.constant 0 : index
    %c0_51 = arith.constant 0 : index
    %c0_52 = arith.constant 0 : index
    %106 = vector.load %arg14[%c0_50, %c0_51, %c0_52] : memref<1x1x32xf32, #tpu.memory_space<vmem>>, vector<1x1x32xf32>
    %107 = vector.shape_cast %106 : vector<1x1x32xf32> to vector<1x32xf32>
    %c0_53 = arith.constant 0 : index
    %c0_54 = arith.constant 0 : index
    %c0_55 = arith.constant 0 : index
    %108 = vector.load %arg15[%c0_53, %c0_54, %c0_55] : memref<1x1x32xf32, #tpu.memory_space<vmem>>, vector<1x1x32xf32>
    %109 = vector.shape_cast %108 : vector<1x1x32xf32> to vector<1x32xf32>
    %cst_56 = arith.constant dense<0.000000e+00> : vector<16xf32>
    %110 = vector.multi_reduction <add>, %105, %cst_56 [1] : vector<16x32xf32> to vector<16xf32>
    %111 = vector.shape_cast %110 : vector<16xf32> to vector<16x1xf32>
    %cst_57 = arith.constant 3.200000e+01 : f32
    %112 = vector.broadcast %cst_57 : f32 to vector<16x1xf32>
    %113 = arith.divf %111, %112 : vector<16x1xf32>
    %114 = vector.broadcast %113 : vector<16x1xf32> to vector<16x32xf32>
    %115 = arith.subf %105, %114 : vector<16x32xf32>
    %116 = arith.mulf %115, %115 : vector<16x32xf32>
    %cst_58 = arith.constant dense<0.000000e+00> : vector<16xf32>
    %117 = vector.multi_reduction <add>, %116, %cst_58 [1] : vector<16x32xf32> to vector<16xf32>
    %118 = vector.shape_cast %117 : vector<16xf32> to vector<16x1xf32>
    %cst_59 = arith.constant 3.200000e+01 : f32
    %119 = vector.broadcast %cst_59 : f32 to vector<16x1xf32>
    %120 = arith.divf %118, %119 : vector<16x1xf32>
    %121 = vector.broadcast %113 : vector<16x1xf32> to vector<16x32xf32>
    %122 = arith.subf %105, %121 : vector<16x32xf32>
    %cst_60 = arith.constant 9.99999974E-6 : f32
    %123 = vector.broadcast %cst_60 : f32 to vector<16x1xf32>
    %124 = arith.addf %120, %123 : vector<16x1xf32>
    %125 = math.rsqrt %124 : vector<16x1xf32>
    %126 = vector.broadcast %125 : vector<16x1xf32> to vector<16x32xf32>
    %127 = arith.mulf %122, %126 : vector<16x32xf32>
    %128 = vector.broadcast %107 : vector<1x32xf32> to vector<16x32xf32>
    %129 = arith.mulf %127, %128 : vector<16x32xf32>
    %130 = vector.broadcast %109 : vector<1x32xf32> to vector<16x32xf32>
    %131 = arith.addf %129, %130 : vector<16x32xf32>
    %132 = vector.shape_cast %131 : vector<16x32xf32> to vector<2x8x32xf32>
    %c0_61 = arith.constant 0 : index
    %c0_62 = arith.constant 0 : index
    %c0_63 = arith.constant 0 : index
    %133 = vector.load %arg16[%c0_61, %c0_62, %c0_63] : memref<2x8x32xf32, #tpu.memory_space<vmem>>, vector<2x8x32xf32>
    tpu.vector_store %arg16[%c0_61, %c0_62, %c0_63], %132 {strides = array<i32>} : memref<2x8x32xf32, #tpu.memory_space<vmem>>, vector<2x8x32xf32>,
    return
  }
  func.func @transform_0(%arg0: i32, %arg1: i32) -> (i32, i32, i32) {
    %c0_i32 = arith.constant 0 : i32
    %c0_i32_0 = arith.constant 0 : i32
    %c0_i32_1 = arith.constant 0 : i32
    return %arg0, %c0_i32, %c0_i32_0 : i32, i32, i32
  }
  func.func @transform_1(%arg0: i32, %arg1: i32) -> (i32, i32, i32) {
    %c0_i32 = arith.constant 0 : i32
    %c0_i32_0 = arith.constant 0 : i32
    %c0_i32_1 = arith.constant 0 : i32
    return %arg0, %c0_i32, %c0_i32_0 : i32, i32, i32
  }
  func.func @transform_2(%arg0: i32, %arg1: i32) -> (i32, i32, i32) {
    %c0_i32 = arith.constant 0 : i32
    %c0_i32_0 = arith.constant 0 : i32
    %c0_i32_1 = arith.constant 0 : i32
    return %arg1, %c0_i32, %c0_i32_0 : i32, i32, i32
  }
  func.func @transform_3(%arg0: i32, %arg1: i32) -> (i32, i32, i32) {
    %c0_i32 = arith.constant 0 : i32
    %c0_i32_0 = arith.constant 0 : i32
    %c0_i32_1 = arith.constant 0 : i32
    return %arg1, %c0_i32, %c0_i32_0 : i32, i32, i32
  }
  func.func @transform_4(%arg0: i32, %arg1: i32) -> (i32, i32, i32) {
    %c0_i32 = arith.constant 0 : i32
    %c0_i32_0 = arith.constant 0 : i32
    %c0_i32_1 = arith.constant 0 : i32
    return %arg1, %c0_i32, %c0_i32_0 : i32, i32, i32
  }
  func.func @transform_5(%arg0: i32, %arg1: i32) -> (i32, i32, i32) {
    %c0_i32 = arith.constant 0 : i32
    %c0_i32_0 = arith.constant 0 : i32
    %c0_i32_1 = arith.constant 0 : i32
    return %arg1, %c0_i32, %c0_i32_0 : i32, i32, i32
  }
  func.func @transform_6(%arg0: i32, %arg1: i32) -> (i32, i32, i32) {
    %c0_i32 = arith.constant 0 : i32
    %c0_i32_0 = arith.constant 0 : i32
    %c0_i32_1 = arith.constant 0 : i32
    return %arg1, %c0_i32, %c0_i32_0 : i32, i32, i32
  }
  func.func @transform_7(%arg0: i32, %arg1: i32) -> (i32, i32, i32) {
    %c0_i32 = arith.constant 0 : i32
    %c0_i32_0 = arith.constant 0 : i32
    %c0_i32_1 = arith.constant 0 : i32
    return %arg1, %c0_i32, %c0_i32_0 : i32, i32, i32
  }
  func.func @transform_8(%arg0: i32, %arg1: i32) -> (i32, i32, i32) {
    %c0_i32 = arith.constant 0 : i32
    %c0_i32_0 = arith.constant 0 : i32
    %c0_i32_1 = arith.constant 0 : i32
    return %arg1, %c0_i32, %c0_i32_0 : i32, i32, i32
  }
  func.func @transform_9(%arg0: i32, %arg1: i32) -> (i32, i32, i32) {
    %c0_i32 = arith.constant 0 : i32
    %c0_i32_0 = arith.constant 0 : i32
    %c0_i32_1 = arith.constant 0 : i32
    return %arg1, %c0_i32, %c0_i32_0 : i32, i32, i32
  }
  func.func @transform_10(%arg0: i32, %arg1: i32) -> (i32, i32, i32) {
    %c0_i32 = arith.constant 0 : i32
    %c0_i32_0 = arith.constant 0 : i32
    %c0_i32_1 = arith.constant 0 : i32
    return %arg1, %c0_i32, %c0_i32_0 : i32, i32, i32
  }
  func.func @transform_11(%arg0: i32, %arg1: i32) -> (i32, i32, i32) {
    %c0_i32 = arith.constant 0 : i32
    %c0_i32_0 = arith.constant 0 : i32
    %c0_i32_1 = arith.constant 0 : i32
    return %arg1, %c0_i32, %c0_i32_0 : i32, i32, i32
  }
  func.func @transform_12(%arg0: i32, %arg1: i32) -> (i32, i32, i32) {
    %c0_i32 = arith.constant 0 : i32
    %c0_i32_0 = arith.constant 0 : i32
    %c0_i32_1 = arith.constant 0 : i32
    return %arg1, %c0_i32, %c0_i32_0 : i32, i32, i32
  }
  func.func @transform_13(%arg0: i32, %arg1: i32) -> (i32, i32, i32) {
    %c0_i32 = arith.constant 0 : i32
    %c0_i32_0 = arith.constant 0 : i32
    %c0_i32_1 = arith.constant 0 : i32
    return %arg1, %c0_i32, %c0_i32_0 : i32, i32, i32
  }
  func.func @transform_14(%arg0: i32, %arg1: i32) -> (i32, i32, i32) {
    %c0_i32 = arith.constant 0 : i32
    %c0_i32_0 = arith.constant 0 : i32
    %c0_i32_1 = arith.constant 0 : i32
    return %arg0, %c0_i32, %c0_i32_0 : i32, i32, i32
  }
}

</mosaic_0001>

<bundles_post_ra>
// kernel: tpu_custom_call.1
= control target key start
LH: loop header
LB: loop body
LE: loop exit
PB: predicated region body
PF: predicated region fallthrough
CT: control target
= control target key end

     0   :  { %s4128_s0 = inlined_call_operand.hbm [shape: f32[2,8,32], index: 0, kind: input, shape index: {}]   ;;  %s4129_s1 = inlined_call_operand.hbm [shape: f32[2,1,8], index: 1, kind: input, shape index: {}]   ;;  %s4130_s2 = inlined_call_operand.vmem [shape: bf16[2,32,96], index: 2, kind: input, shape index: {}]   ;;  %s4131_s3 = inlined_call_operand.hbm [shape: f32[2,1,96], index: 3, kind: input, shape index: {}]   ;;  %s4132_s4 = inlined_call_operand.vmem [shape: bf16[2,32,32], index: 4, kind: input, shape index: {}]   ;;  %s4133_s5 = inlined_call_operand.vmem [shape: f32[2,1,32], index: 5, kind: input, shape index: {}]   ;;  %s4134_s6 = inlined_call_operand.vmem [shape: f32[2,1,32], index: 6, kind: input, shape index: {}]   ;;  %s4135_s7 = inlined_call_operand.hbm [shape: f32[2,1,32], index: 7, kind: input, shape index: {}]   ;;  %s4136_s8 = inlined_call_operand.vmem [shape: bf16[2,32,64], index: 8, kind: input, shape index: {}]   ;;  %s4137_s9 = inlined_call_operand.vmem [shape: f32[2,1,64], index: 9, kind: input, shape index: {}]   ;;  %s4138_s10 = inlined_call_operand.vmem [shape: bf16[2,64,32], index: 10, kind: input, shape index: {}]   ;;  %s4139_s11 = inlined_call_operand.vmem [shape: f32[2,1,32], index: 11, kind: input, shape index: {}]   ;;  %s4140_s12 = inlined_call_operand.vmem [shape: f32[2,1,32], index: 12, kind: input, shape index: {}]   ;;  %s4141_s13 = inlined_call_operand.hbm [shape: f32[2,1,32], index: 13, kind: input, shape index: {}]   ;;  %s4142_s14 = inlined_call_operand.hbm [shape: f32[2,8,32], index: 14, kind: output, shape index: {}]  }
   0x1   :  { %4146 = sst [smem:[#allocation19_spill]] %s4128_s0 }
   0x2   :  { %4147 = sst [smem:[#allocation20_spill]] %s4129_s1 }
   0x3   :  { %4148 = sst [smem:[#allocation21_spill]] %s4130_s2 }
   0x4   :  { %4149 = sst [smem:[#allocation22_spill]] %s4131_s3 }
   0x5   :  { %4150 = sst [smem:[#allocation23_spill]] %s4132_s4 }
   0x6   :  { %4151 = sst [smem:[#allocation24_spill]] %s4135_s7 }
   0x7   :  { %4152 = sst [smem:[#allocation25_spill]] %s4136_s8 }
   0x8   :  { %4153 = sst [smem:[#allocation26_spill]] %s4137_s9 }
   0x9   :  { %4154 = sst [smem:[#allocation27_spill]] %s4138_s10 }
   0xa   :  { %4155 = sst [smem:[#allocation28_spill]] %s4139_s11 }
   0xb   :  { %4156 = sst [smem:[#allocation29_spill]] %s4140_s12 }
   0xc   :  { %4157 = sst [smem:[#allocation30_spill]] %s4141_s13 }
   0xd   :  { %4158 = sst [smem:[#allocation31_spill]] %s4142_s14 }
   0xe   :  { %19 = vsyncpa [#allocation3], 0 }
   0xf   :  { %20 = vsyncpa [#allocation6], 0 }
  0x10   :  { %21 = vsyncpa [#allocation4], 0  ;;  %s3377_s29 = smov 0   ;;  %s3379_s30 = smov 0  }
  0x11   :  { %s3381_s15 = smov 0   ;;  %s3383_s16 = smov 0  }
  0x12   :  { %s3385_s17 = smov 0   ;;  %s3387_s18 = smov 0  }
  0x13 LB: > { %4159 = sst [smem:[#allocation15_spill]] %s3269_s15  ;;  %s3406_s19 = sadd.s32 4294967295, %s3281_s18   ;;  %s3281_s18 = sphi %s3387_s18, %s27_s18   ;;  %s3277_s17 = sphi %s3385_s17, %s4194_s17   ;;  %s3273_s16 = sphi %s3383_s16, %s4193_s16   ;;  %s3269_s15 = sphi %s3381_s15, %s4189_s15   ;;  %s3265_s30 = sphi %s3379_s30, %s4192_s30   ;;  %s3261_s29 = sphi %s3377_s29, %s4191_s29  }
  0x14   : > { %4160 = sst [smem:[#allocation16_spill]] %s3281_s18  ;;  %p137_p0 = scmp.ne.s32.totalorder %s3265_s30, %s3261_s29 }
  0x15   : > { %p138_p1 = scmp.eq.s32.totalorder %s3406_s19, 0  ;;  %p2729_p2 = scmp.ge.s32.totalorder %s3281_s18, 1 }
  0x16   : > { %p434_p3 = scmp.lt.s32.totalorder %s3281_s18, 3  ;;  %s4162_s0 = sld [smem:[#allocation19_spill]] }
  0x17   : > { %p3414_p4 = por %p138_p1, %p137_p0  ;;  %s3283_s25 = smov [#allocation2]  }
  0x18   : > { %p3421_p5 = pnand %p2729_p2, %p434_p3  ;;  %s450_s26 = sshll.u32 %s3283_s25, 4  ;;  %s451_s26 = int_to_ptr.vmem [resolvable:$true] %s450_s26 }
  0x19   : > { %s3284_s28 = smov 128   ;;  %s3285_s29 = smov 8  }
  0x1a   : > { %p2841_p6 = pneg %p3421_p5  ;;  %s36_s21 = sadd.s32 1, %s3277_s17 }
  0x1b   : > { %p37_p8 = scmp.ge.s32.totalorder %s36_s21, 2  ;;  %s124_s22 = sadd.s32 1, %s3269_s15 }
  0x1c   : > { %s448_s23 = sshll.u32 %s4162_s0, 4  ;;  %p3429_p7 = pnand %p2841_p6, %p138_p1  ;;  %s449_s23 = int_to_ptr.hbm [resolvable:$true] %s448_s23 }
  0x1d   : > { %p131_p9 = scmp.ne.s32.totalorder %s3269_s15, %s3265_s30  ;;  %p132_p10 = scmp.eq.s32.totalorder %s3281_s18, 0 }
  0x1e   : > { %2844 = dma.hbm_to_vmem [thread:$0]  (!%p3429_p7), %s449_s23, 256, %s451_s26, [#allocation3], %s3284_s28, %s3284_s28, %s3285_s29  }
  0x1f   : > { %s4196_s21 = smov (%p37_p8, %s36_s21), 0  ;;  %p3442_p11 = por %p132_p10, %p131_p9 }
  0x20   : > { %4165 = sst [smem:[#allocation17_spill]] %s4196_s21  ;;  %p2860_p12 = scmp.lt.s32.totalorder %s3281_s18, 2 }
  0x21   : > { %s121_s0 = ssub.s32 %s3277_s17, %s4196_s21  ;;  %s488_s14 = sand.u32 1, %s3281_s18  }
  0x22   : > { %p122_p13 = scmp.eq.s32.totalorder %s121_s0, 0  ;;  %s3451_s12 = sand.u32 1, %s3269_s15  }
  0x23   : > { %s4167_s3 = sld [smem:[#allocation22_spill]]  ;;  %s491_s10 = scalar_lea.vmem [#allocation7], %s3451_s12 }
  0x24   : > { %s3458_s29 = scalar_select %p122_p13, %s3269_s15, %s124_s22  }
  0x25   : > { %s498_s9 = sshll.u32 %s491_s10, 4  ;;  %p3463_p0 = pnand %p2860_p12, %p3442_p11  ;;  %s499_s9 = int_to_ptr.vmem [resolvable:$true] %s498_s9 }
  0x26   : > { %4168 = sst [smem:[#allocation18_spill]] %s3458_s29  ;;  %s489_s22 = scalar_lea.sflag [#allocation3], %s488_s14 }
  0x27   : > { %s4170_s7 = sld [smem:[#allocation24_spill]]  ;;  %s528_s10 = scalar_lea.vmem [#allocation8], %s3451_s12 }
  0x28   : > { %s535_s25 = sshll.u32 %s528_s10, 4  ;;  %s4171_s1 = sld [smem:[#allocation20_spill]]  ;;  %s536_s25 = int_to_ptr.vmem [resolvable:$true] %s535_s25 }
  0x29   : > { %s494_s28 = scalar_lea.hbm %s4167_s3, %s3277_s17  ;;  %s3286_s18 = smov [#allocation5]  }
  0x2a   : > { %s496_s11 = sshll.u32 %s494_s28, 4  ;;  %s466_s0 = sshll.u32 %s3286_s18, 4  ;;  %s497_s11 = int_to_ptr.hbm [resolvable:$true] %s496_s11  ;;  %s467_s0 = int_to_ptr.vmem [resolvable:$true] %s466_s0 }
  0x2b   : > { %2851 = dma.hbm_to_vmem [thread:$0]  (!%p3463_p0), %s497_s11, 16, %s499_s9, %s489_s22  }
  0x2c   : > { %s3288_s14 = smov 1   ;;  %s4172_s13 = sld [smem:[#allocation30_spill]] }
  0x2d   : > { %s531_s23 = scalar_lea.hbm %s4170_s7, %s3277_s17  ;;  %s579_s15 = scalar_lea.vmem [#allocation9], %s3451_s12 }
  0x2e   : > { %s533_s26 = sshll.u32 %s531_s23, 4  ;;  %s464_s29 = sshll.u32 %s4171_s1, 4  ;;  %s534_s26 = int_to_ptr.hbm [resolvable:$true] %s533_s26  ;;  %s465_s29 = int_to_ptr.hbm [resolvable:$true] %s464_s29 }
  0x2f   : > { %2854 = dma.hbm_to_vmem [thread:$0]  (!%p3463_p0), %s534_s26, 16, %s536_s25, %s489_s22  }
  0x30   : > { %s3287_s23 = smov 16   ;;  %s586_s8 = sshll.u32 %s579_s15, 4  ;;  %s587_s8 = int_to_ptr.vmem [resolvable:$true] %s586_s8 }
  0x31   : > { %2847 = dma.hbm_to_vmem [thread:$0]  (!%p3429_p7), %s465_s29, 32, %s467_s0, [#allocation6], %s3287_s23, %s3287_s23, %s3288_s14  }
  0x32   : > { %s582_s10 = scalar_lea.hbm %s4172_s13, %s3277_s17  ;;  %595 = sbr.rel (%p3421_p5) target bundleno = 2158 (0x86e), region = 76 }
  0x33   : > { %s584_s7 = sshll.u32 %s582_s10, 4  ;;  %s585_s7 = int_to_ptr.hbm [resolvable:$true] %s584_s7 }
  0x34   : > { %2857 = dma.hbm_to_vmem [thread:$0]  (!%p3463_p0), %s585_s7, 16, %s587_s8, %s489_s22  }
  0x37   : > { %3244 = dma.done.wait (%p138_p1), [#allocation3], 256  }
  0x38   : > { %3246 = vsyncadd (%p138_p1), [#allocation3], 4294967040 }
  0x39   : > { %3248 = dma.done.wait (%p138_p1), [#allocation6], 32  }
  0x3a   : > { %3250 = vsyncadd (%p138_p1), [#allocation6], 4294967264  ;;  %s607_s3 = sand.u32 1, %s3406_s19   ;;  %s3500_s7 = sand.u32 1, %s3265_s30  }
  0x3b   : > { %s608_s8 = scalar_lea.sflag [#allocation3], %s607_s3 }
  0x3c   : > { %3252 = dma.done.wait (%p3414_p4), %s608_s8, 48  }
  0x3d   : > { %3254 = vsyncadd (%p3414_p4), %s608_s8, 4294967248  ;;  %p713_p2 = scmp.lt.s32.totalorder %s3273_s16, 1  ;;  %s4173_s2 = sld [smem:[#allocation21_spill]] }
  0x3e   : > { %s4174_s4 = sld [smem:[#allocation23_spill]]  ;;  %s628_s11 = scalar_lea.vmem [#allocation9], %s3500_s7 }
  0x3f   : > { %s3509_s15 = scalar_select %p713_p2, %s3273_s16, 1 }
  0x40   : > { %s4175_s10 = sld [smem:[#allocation25_spill]]  ;;  %p2744_p1 = scmp.ne.s32.totalorder %s3273_s16, 0 }
  0x41   : > { %s2809_s24 = sshll.u32 %s3509_s15, 4  ;;  %s4176_s21 = sld [smem:[#allocation26_spill]] }
  0x42   : > { %s2812_s29 = sshll.u32 %s3509_s15, 5  ;;  %s4177_s1 = sld [smem:[#allocation27_spill]] }
  0x43   : > { %s717_s22 = scalar_lea.vmem %s4173_s2, %s2809_s24  ;;  %s4179_s13 = sld [smem:[#allocation29_spill]] }
  0x44   : > { %s3522_s18 = scalar_lea.vmem %s4174_s4, %s2809_s24  ;;  %s4178_s4 = sld [smem:[#allocation28_spill]] }
  0x46   : > { %s3531_s3 = scalar_lea.vmem %s4175_s10, %s2809_s24  ;;  %s619_s24 = scalar_lea.vmem [#allocation8], %s3500_s7 }
  0x47   : > { %s736_s20 = scalar_lea.vmem %s4176_s21, %s3509_s15  ;;  %753 = sbr.rel (%p2744_p1) target bundleno = 79 (0x4f), region = 100 }
  0x48   : > { %s3541_s25 = scalar_lea.vmem %s4177_s1, %s2812_s29 }
  0x49   : > { %s747_s9 = scalar_lea.vmem %s4179_s13, %s3509_s15 }
  0x4a   : > { %s744_s0 = scalar_lea.vmem %s4178_s4, %s3509_s15 }
  0x4c   : > { %v754_v0 = vld [vmem:[#allocation2] sm:$0xff]  ;;  %vm756_vm0 = vcmask 261120   ;;  %v755_v1 = vld [vmem:[#allocation2 + $0x8] sm:$0xff] }
  0x4d   : > { %757 = vst.msk [vmem:[#allocation10] sm:$0xff] %vm756_vm0, %v754_v0 }
  0x4e   : > { %758 = vst.msk [vmem:[#allocation10 + $0x8] sm:$0xff] %vm756_vm0, %v755_v1 }
  0x4f PF: > { %v2814_v2 = vld [vmem:[%s717_s22 + $0x8] sm:$0xff]  ;;  %v2813_v3 = vld [vmem:[%s717_s22] sm:$0xff]  ;;  %vm782_vm1 = vcmask 261120   ;;  %s4180_s1 = scalar_lea.vmem [#allocation7], %s3500_s7  ;;  %s3289_s2 = smov 104   ;;  %vm821_vm2 = vcmask 1047556  }
  0x50   : > { %792 = vmatpush.bf16.msra.mxu0 %v2814_v2  ;;  %v2987_v7 = vld [vmem:[%s4180_s1] ss:$0 sm:$0xff]  ;;  %s3290_s4 = smov 120   ;;  %s3291_s13 = smov 112   ;;  %v3292_v18 = vmov 1983009808  }
  0x51   : > { %v826_v19 = vunpack.c.l.s4 %v3292_v18  ;;  %s3293_s16 = smov 96   ;;  %v3294_v28 = vmov 1934713408   ;;  %vm1565_vm3 = vcmask 64512   ;;  %s3295_s12 = smov 64   ;;  %vm1849_vm4 = vcmask 1043456  }
  0x52   : > { %v850_v29 = vunpack.c.l.s4 %v3294_v28  ;;  %s3296_s22 = smov 24   ;;  %s3297_s14 = smov 16   ;;  %vm2245_vm5 = vcmask 130048   ;;  %vm2248_vm6 = vcmask 195584   ;;  %vm2431_vm14 = vcmask 523264  }
  0x53   : > { %v3569_v22 = vunpack.c.0.s8 %v826_v19  ;;  %s3298_s10 = smov 8   ;;  %s4181_s27 = scalar_lea.vmem %s4133_s5, %s3509_s15 }
  0x54   : > { %v759_v4 = vld [vmem:[#allocation10] sm:$0xff]  ;;  %793 = vmatpush.bf16.msra.mxu0 %v2813_v3  ;;  %v3593_v40 = vunpack.c.0.s8 %v850_v29  ;;  %s4182_s29 = scalar_lea.vmem %s4134_s6, %s3509_s15  ;;  %s3300_s15 = smov [#allocation10]  }
  0x55   : > { %v760_v5 = vld [vmem:[#allocation10 + $0x8] sm:$0xff]  ;;  %s4186_s7 = sld [smem:[#allocation31_spill]]  ;;  %p2863_p3 = scmp.eq.s32.totalorder %s3406_s19, 1 }
  0x56   : > { %v761_v6 = vpack.c.bf16 %v760_v5, %v759_v4 }
  0x58   : > { %2753 = vmatmul.msk.bf16.vlgmr.msra.gmra.mxu0 %vm782_vm1, %v761_v6 }
  0xd5   : > { %v795_v8 = vpop.f32.mrf.mxu0 }
  0xd6   : > { %v796_v9 = vadd.f32 %v2987_v7, %v795_v8 }
  0xd8   : > { %814 = vrot.lane.b32.xlu1 %v796_v9, %s3289_s2  ;;  %802 = vrot.lane.b32.xlu0 %v796_v9, %s3290_s4  ;;  %v823_v26 = vrot.slane %v796_v9, 4 }
  0xdd   : > { %v797_v10 = vpop.f32.mrf.mxu0 }
  0xde   : > { %v3557_v11 = vadd.f32 %v2987_v7, %v797_v10 }
  0xe0   : > { %810 = vrot.lane.b32.xlu2 %v3557_v11, %s3291_s13  ;;  %804 = vrot.lane.b32.xlu1 %v3557_v11, %s3290_s4 }
  0xe1   : > { %808 = vrot.lane.b32.xlu0 %v796_v9, %s3291_s13 }
  0xe8   : > { %816 = vrot.lane.b32.xlu2 %v3557_v11, %s3289_s2 }
 0x13a   : > { %v3562_v12 = vpop.permute.xlu2 %810 }
 0x142   : > { %v3571_v23 = vpop.permute.xlu2 %816 }
 0x143   : > { %v3583_v32 = vpack.i.bf16 %v3571_v23, %v3562_v12 }
 0x14a   : > { %v815_v13 = vpop.permute.xlu1 %814  ;;  %v803_v14 = vpop.permute.xlu0 %802 }
 0x14b   : > { %v833_v15 = vrot.slane %v815_v13, 4  ;;  %v835_v16 = vrot.slane %v803_v14, 4  ;;  %v3564_v17 = vpack.i.bf16 %v803_v14, %v796_v9 }
 0x14d   : > { %v834_v20 = vsel %vm821_vm2, %v833_v15, %v803_v14  ;;  %v836_v21 = vsel %vm821_vm2, %v815_v13, %v835_v16  ;;  %2933 = vrot.lane.b32.xlu0 %v3564_v17, %s3293_s16 }
 0x14e   : > { %v844_v24 = vperm.slane %v836_v21, %v3569_v22  ;;  %v840_v27 = vperm.slane %v834_v20, %v3569_v22 }
 0x150   : > { %v857_v37 = vrot.slane %v844_v24, 4  ;;  %v845_v39 = vrot.slane %v840_v27, 4 }
 0x152   : > { %v3574_v25 = vpop.permute.xlu1 %804 }
 0x153   : > { %v809_v30 = vpop.permute.xlu0 %808  ;;  %v3579_v31 = vpack.i.bf16 %v3574_v25, %v3557_v11 }
 0x154   : > { %v820_v33 = vrot.slane %v809_v30, 4  ;;  %v824_v34 = vsel %vm821_vm2, %v809_v30, %v823_v26  ;;  %v3586_v35 = vpack.i.bf16 %v815_v13, %v809_v30 }
 0x155   : > { %v832_v36 = vperm.slane %v824_v34, %v3569_v22  ;;  %2943 = vrot.lane.b32.xlu2 %v3579_v31, %s3293_s16  ;;  %2948 = vrot.lane.b32.xlu0 %v3583_v32, %s3293_s16  ;;  %v877_v34 = vrot.slane %v3562_v12, 4 }
 0x156   : > { %v822_v38 = vsel %vm821_vm2, %v820_v33, %v796_v9  ;;  %2938 = vrot.lane.b32.xlu1 %v3586_v35, %s3293_s16  ;;  %s3301_s16 = smov 128  }
 0x157   : > { %v828_v41 = vperm.slane %v822_v38, %v3569_v22  ;;  %v859_v42 = vrot.slane %v832_v36, 4  ;;  %v858_v43 = vsel %vm821_vm2, %v857_v37, %v832_v36  ;;  %v889_v36 = vrot.slane %v3571_v23, 4 }
 0x158   : > { %v864_v47 = vperm.slane %v858_v43, %v3593_v40  ;;  %v878_v37 = vsel %vm821_vm2, %v877_v34, %v3557_v11 }
 0x159   : > { %v846_v44 = vsel %vm821_vm2, %v845_v39, %v828_v41  ;;  %v847_v45 = vrot.slane %v828_v41, 4  ;;  %v860_v46 = vsel %vm821_vm2, %v844_v24, %v859_v42  ;;  %v890_v38 = vsel %vm821_vm2, %v889_v36, %v3574_v25 }
 0x15a   : > { %v852_v49 = vperm.slane %v846_v44, %v3593_v40  ;;  %v868_v50 = vperm.slane %v860_v46, %v3593_v40  ;;  %v873_v52 = vrot.slane %v864_v47, 4  ;;  %v891_v39 = vrot.slane %v3574_v25, 4 }
 0x15b   : > { %v848_v48 = vsel %vm821_vm2, %v840_v27, %v847_v45  ;;  %v879_v41 = vrot.slane %v3557_v11, 4  ;;  %v884_v42 = vperm.slane %v878_v37, %v3569_v22  ;;  %v896_v44 = vperm.slane %v890_v38, %v3569_v22 }
 0x15c   : > { %v856_v51 = vperm.slane %v848_v48, %v3593_v40  ;;  %v875_v53 = vrot.slane %v868_v50, 4  ;;  %v869_v54 = vrot.slane %v852_v49, 4  ;;  %v874_v62 = vsel %vm821_vm2, 0.0, %v873_v52 }
 0x15d   : > { %v880_v43 = vsel %vm821_vm2, %v3562_v12, %v879_v41  ;;  %v892_v45 = vsel %vm821_vm2, %v3571_v23, %v891_v39 }
 0x15e   : > { %v871_v55 = vrot.slane %v856_v51, 4  ;;  %v876_v56 = vsel %vm821_vm2, 0.0, %v875_v53  ;;  %v944_v57 = vsel %vm821_vm2, %v875_v53, %v864_v47  ;;  %v870_v1 = vsel %vm821_vm2, 0.0, %v869_v54 }
 0x15f   : > { %v948_v58 = vperm.slane %v944_v57, %v3569_v22  ;;  %v949_v59 = vrot.slane %v876_v56, 4  ;;  %v888_v46 = vperm.slane %v880_v43, %v3569_v22  ;;  %v903_v47 = vrot.slane %v884_v42, 4 }
 0x160   : > { %v872_v60 = vsel %vm821_vm2, 0.0, %v871_v55  ;;  %v933_v61 = vsel %vm821_vm2, %v871_v55, %v852_v49  ;;  %v900_v48 = vperm.slane %v892_v45, %v3569_v22  ;;  %v901_v49 = vrot.slane %v896_v44, 4 }
 0x161   : > { %v937_v63 = vperm.slane %v933_v61, %v3569_v22  ;;  %v938_v0 = vrot.slane %v872_v60, 4  ;;  %v950_v2 = vsel %vm821_vm2, %v949_v59, %v874_v62  ;;  %v969_v3 = vrot.slane %v948_v58, 4 }
 0x162   : > { %v954_v5 = vperm.slane %v950_v2, %v3569_v22  ;;  %v904_v25 = vsel %vm821_vm2, %v896_v44, %v903_v47  ;;  %v915_v50 = vrot.slane %v888_v46, 4  ;;  %v902_v11 = vsel %vm821_vm2, %v901_v49, %v884_v42 }
 0x163   : > { %v939_v4 = vsel %vm821_vm2, %v938_v0, %v870_v1  ;;  %v957_v6 = vrot.slane %v937_v63, 4  ;;  %v912_v51 = vperm.slane %v904_v25, %v3593_v40  ;;  %v913_v52 = vrot.slane %v900_v48, 4 }
 0x164   : > { %v943_v7 = vperm.slane %v939_v4, %v3569_v22  ;;  %v970_v8 = vsel %vm821_vm2, %v954_v5, %v969_v3  ;;  %v967_v9 = vrot.slane %v954_v5, 4  ;;  %v916_v12 = vsel %vm821_vm2, %v900_v48, %v915_v50 }
 0x165   : > { %v978_v13 = vperm.slane %v970_v8, %v3593_v40  ;;  %v908_v53 = vperm.slane %v902_v11, %v3593_v40  ;;  %v914_v23 = vsel %vm821_vm2, %v913_v52, %v888_v46  ;;  %v924_v54 = vperm.slane %v916_v12, %v3593_v40 }
 0x166   : > { %v958_v10 = vsel %vm821_vm2, %v943_v7, %v957_v6  ;;  %v955_v14 = vrot.slane %v943_v7, 4  ;;  %v968_v16 = vsel %vm821_vm2, %v967_v9, %v948_v58  ;;  %v927_v55 = vrot.slane %v912_v51, 4 }
 0x167   : > { %v966_v15 = vperm.slane %v958_v10, %v3593_v40  ;;  %v983_v18 = vrot.slane %v978_v13, 4  ;;  %v974_v20 = vperm.slane %v968_v16, %v3593_v40  ;;  %v920_v56 = vperm.slane %v914_v23, %v3593_v40 }
 0x168   : > { %v956_v19 = vsel %vm821_vm2, %v955_v14, %v937_v63  ;;  %v925_v57 = vrot.slane %v908_v53, 4  ;;  %v928_v59 = vsel %vm821_vm2, 0.0, %v927_v55  ;;  %v931_v60 = vrot.slane %v924_v54, 4 }
 0x169   : > { %v985_v21 = vrot.slane %v966_v15, 4  ;;  %v962_v24 = vperm.slane %v956_v19, %v3593_v40  ;;  %v3625_v26 = vsel %vm821_vm2, %v983_v18, %v966_v15  ;;  %v979_v27 = vrot.slane %v974_v20, 4 }
 0x16a   : > { %v926_v62 = vsel %vm821_vm2, 0.0, %v925_v57  ;;  %v929_v63 = vrot.slane %v920_v56, 4  ;;  %v987_v0 = vsel %vm821_vm2, %v927_v55, %v908_v53  ;;  %v992_v1 = vrot.slane %v928_v59, 4 }
 0x16b   : > { %v3628_v28 = vsel %vm821_vm2, %v978_v13, %v985_v21  ;;  %v981_v29 = vrot.slane %v962_v24, 4  ;;  %v3631_v30 = vsel %vm821_vm2, %v979_v27, %v962_v24  ;;  %v3664_v2 = vsel %vm821_vm2, 0.0, %v931_v60 }
 0x16c   : > { %v998_v3 = vsel %vm821_vm2, %v931_v60, %v920_v56  ;;  %v3668_v8 = vperm.slane %v987_v0, %v3569_v22  ;;  %v3671_v9 = vsel %vm821_vm2, 0.0, %v929_v63  ;;  %v1003_v10 = vrot.slane %v3664_v2, 4 }
 0x16d   : > { %v3634_v33 = vsel %vm821_vm2, %v974_v20, %v981_v29  ;;  %v3675_v14 = vsel %vm821_vm2, %v992_v1, %v926_v62  ;;  %v3678_v15 = vperm.slane %v998_v3, %v3569_v22 }
 0x1af   : > { %v2944_v61 = vpop.permute.xlu2 %2943 }
 0x1b0   : > { %v2946_v4 = vunpack.i.h.bf16 %v2944_v61  ;;  %v2945_v5 = vunpack.i.l.bf16 %v2944_v61 }
 0x1b2   : > { %v1143_v16 = vrot.slane %v2946_v4, 4  ;;  %v1131_v18 = vrot.slane %v2945_v5, 4 }
 0x1bf   : > { %v2934_v58 = vpop.permute.xlu0 %2933 }
 0x1c0   : > { %v2936_v6 = vunpack.i.h.bf16 %v2934_v58  ;;  %v2935_v7 = vunpack.i.l.bf16 %v2934_v58 }
 0x1c2   : > { %v1087_v24 = vrot.slane %v2936_v6, 4  ;;  %v1075_v27 = vrot.slane %v2935_v7, 4 }
 0x1c7   : > { %v2949_v13 = vpop.permute.xlu0 %2948 }
 0x1c8   : > { %v2939_v19 = vpop.permute.xlu1 %2938  ;;  %v2951_v20 = vunpack.i.h.bf16 %v2949_v13  ;;  %v2950_v21 = vunpack.i.l.bf16 %v2949_v13 }
 0x1c9   : > { %v2941_v29 = vunpack.i.h.bf16 %v2939_v19  ;;  %v2940_v34 = vunpack.i.l.bf16 %v2939_v19 }
 0x1ca   : > { %v1141_v36 = vrot.slane %v2951_v20, 4  ;;  %v1144_v37 = vsel %vm821_vm2, %v2951_v20, %v1143_v16  ;;  %v1129_v38 = vrot.slane %v2950_v21, 4  ;;  %v1132_v39 = vsel %vm821_vm2, %v2950_v21, %v1131_v18 }
 0x1cb   : > { %v1085_v41 = vrot.slane %v2941_v29, 4  ;;  %v1073_v42 = vrot.slane %v2940_v34, 4  ;;  %v1076_v43 = vsel %vm821_vm2, %v2940_v34, %v1075_v27  ;;  %v1088_v44 = vsel %vm821_vm2, %v2941_v29, %v1087_v24 }
 0x1cc   : > { %v1084_v45 = vperm.slane %v1076_v43, %v3569_v22  ;;  %v1096_v46 = vperm.slane %v1088_v44, %v3569_v22  ;;  %v1142_v47 = vsel %vm821_vm2, %v1141_v36, %v2946_v4  ;;  %v1152_v48 = vperm.slane %v1144_v37, %v3569_v22 }
 0x1cd   : > { %v1074_v49 = vsel %vm821_vm2, %v1073_v42, %v2935_v7  ;;  %v1086_v25 = vsel %vm821_vm2, %v1085_v41, %v2936_v6  ;;  %v1148_v50 = vperm.slane %v1142_v47, %v3569_v22  ;;  %v1130_v11 = vsel %vm821_vm2, %v1129_v38, %v2945_v5 }
 0x1ce   : > { %v1080_v51 = vperm.slane %v1074_v49, %v3569_v22  ;;  %v1092_v52 = vperm.slane %v1086_v25, %v3569_v22  ;;  %v1109_v12 = vrot.slane %v1096_v46, 4  ;;  %v1111_v53 = vrot.slane %v1084_v45, 4 }
 0x1cf   : > { %v1153_v23 = vrot.slane %v1148_v50, 4  ;;  %v1165_v54 = vrot.slane %v1152_v48, 4  ;;  %v1136_v55 = vperm.slane %v1130_v11, %v3569_v22  ;;  %v1140_v56 = vperm.slane %v1132_v39, %v3569_v22 }
 0x1d0   : > { %v1097_v57 = vrot.slane %v1092_v52, 4  ;;  %v1099_v58 = vrot.slane %v1080_v51, 4  ;;  %v1110_v59 = vsel %vm821_vm2, %v1109_v12, %v1084_v45  ;;  %v1112_v60 = vsel %vm821_vm2, %v1096_v46, %v1111_v53 }
 0x1d1   : > { %v1116_v61 = vperm.slane %v1110_v59, %v3593_v40  ;;  %v1120_v62 = vperm.slane %v1112_v60, %v3593_v40  ;;  %v1154_v63 = vsel %vm821_vm2, %v1153_v23, %v1136_v55  ;;  %v1155_v0 = vrot.slane %v1136_v55, 4 }
 0x1d2   : > { %v1098_v1 = vsel %vm821_vm2, %v1097_v57, %v1080_v51  ;;  %v1100_v3 = vsel %vm821_vm2, %v1092_v52, %v1099_v58  ;;  %v1160_v4 = vperm.slane %v1154_v63, %v3593_v40  ;;  %v1166_v5 = vsel %vm821_vm2, %v1165_v54, %v1140_v56 }
 0x1d3   : > { %v1104_v6 = vperm.slane %v1098_v1, %v3593_v40  ;;  %v1108_v7 = vperm.slane %v1100_v3, %v3593_v40  ;;  %v1125_v13 = vrot.slane %v1116_v61, 4  ;;  %v1127_v16 = vrot.slane %v1120_v62, 4 }
 0x1d4   : > { %v1156_v18 = vsel %vm821_vm2, %v1148_v50, %v1155_v0  ;;  %v1167_v19 = vrot.slane %v1140_v56, 4  ;;  %v1172_v20 = vperm.slane %v1166_v5, %v3593_v40  ;;  %v1177_v21 = vrot.slane %v1160_v4, 4 }
 0x1d5   : > { %v1121_v24 = vrot.slane %v1104_v6, 4  ;;  %v1123_v27 = vrot.slane %v1108_v7, 4  ;;  %v1126_v29 = vsel %vm821_vm2, 0.0, %v1125_v13  ;;  %v1128_v34 = vsel %vm821_vm2, 0.0, %v1127_v16 }
 0x1d6   : > { %v1201_v36 = vrot.slane %v1128_v34, 4  ;;  %v1164_v37 = vperm.slane %v1156_v18, %v3593_v40  ;;  %v1168_v38 = vsel %vm821_vm2, %v1152_v48, %v1167_v19  ;;  %v1181_v39 = vrot.slane %v1172_v20, 4 }
 0x1d7   : > { %v1124_v41 = vsel %vm821_vm2, 0.0, %v1123_v27  ;;  %v1176_v42 = vperm.slane %v1168_v38, %v3593_v40  ;;  %v1122_v43 = vsel %vm821_vm2, 0.0, %v1121_v24  ;;  %v1185_v44 = vsel %vm821_vm2, %v1123_v27, %v1104_v6 }
 0x1d8   : > { %v1179_v45 = vrot.slane %v1164_v37, 4  ;;  %v1182_v46 = vsel %vm821_vm2, 0.0, %v1181_v39  ;;  %v1189_v47 = vperm.slane %v1185_v44, %v3569_v22  ;;  %v1190_v49 = vrot.slane %v1124_v41, 4 }
 0x1d9   : > { %v1183_v25 = vrot.slane %v1176_v42, 4  ;;  %v1196_v50 = vsel %vm821_vm2, %v1127_v16, %v1116_v61  ;;  %v1202_v48 = vsel %vm821_vm2, %v1201_v36, %v1126_v29  ;;  %v1178_v11 = vsel %vm821_vm2, 0.0, %v1177_v21 }
 0x1da   : > { %v1180_v51 = vsel %vm821_vm2, 0.0, %v1179_v45  ;;  %v1191_v52 = vsel %vm821_vm2, %v1190_v49, %v1122_v43  ;;  %v1200_v12 = vperm.slane %v1196_v50, %v3569_v22  ;;  %v1206_v53 = vperm.slane %v1202_v48, %v3569_v22 }
 0x1db   : > { %v1184_v23 = vsel %vm821_vm2, 0.0, %v1183_v25  ;;  %v1244_v54 = vrot.slane %v1180_v51, 4  ;;  %v1250_v55 = vsel %vm821_vm2, %v1183_v25, %v1172_v20  ;;  %v1195_v56 = vperm.slane %v1191_v52, %v3569_v22 }
 0x1dc   : > { %v1255_v57 = vrot.slane %v1184_v23, 4  ;;  %v1209_v58 = vrot.slane %v1189_v47, 4  ;;  %v1221_v59 = vrot.slane %v1200_v12, 4  ;;  %v1239_v60 = vsel %vm821_vm2, %v1179_v45, %v1160_v4 }
 0x1dd   : > { %v1243_v61 = vperm.slane %v1239_v60, %v3569_v22  ;;  %v1245_v62 = vsel %vm821_vm2, %v1244_v54, %v1178_v11  ;;  %v1254_v63 = vperm.slane %v1250_v55, %v3569_v22  ;;  %v1207_v0 = vrot.slane %v1195_v56, 4 }
 0x1de   : > { %v1210_v1 = vsel %vm821_vm2, %v1195_v56, %v1209_v58  ;;  %v1222_v3 = vsel %vm821_vm2, %v1206_v53, %v1221_v59  ;;  %v1249_v5 = vperm.slane %v1245_v62, %v3569_v22  ;;  %v1256_v6 = vsel %vm821_vm2, %v1255_v57, %v1182_v46 }
 0x1df   : > { %v1218_v7 = vperm.slane %v1210_v1, %v3593_v40  ;;  %v1230_v13 = vperm.slane %v1222_v3, %v3593_v40  ;;  %v1260_v4 = vperm.slane %v1256_v6, %v3569_v22  ;;  %v1263_v16 = vrot.slane %v1243_v61, 4 }
 0x1e0   : > { %v1275_v18 = vrot.slane %v1254_v63, 4  ;;  %v1208_v19 = vsel %vm821_vm2, %v1207_v0, %v1189_v47  ;;  %v1219_v20 = vrot.slane %v1206_v53, 4  ;;  %v1261_v21 = vrot.slane %v1249_v5, 4 }
 0x1e1   : > { %v1235_v24 = vrot.slane %v1230_v13, 4  ;;  %v1264_v27 = vsel %vm821_vm2, %v1249_v5, %v1263_v16  ;;  %v1214_v29 = vperm.slane %v1208_v19, %v3593_v40  ;;  %v1237_v34 = vrot.slane %v1218_v7, 4 }
 0x1e2   : > { %v1272_v36 = vperm.slane %v1264_v27, %v3593_v40  ;;  %v1276_v37 = vsel %vm821_vm2, %v1260_v4, %v1275_v18  ;;  %v1220_v38 = vsel %vm821_vm2, %v1219_v20, %v1200_v12  ;;  %v1262_v39 = vsel %vm821_vm2, %v1261_v21, %v1243_v61 }
 0x1e3   : > { %v1236_v41 = vsel %vm821_vm2, %v1235_v24, %v1218_v7  ;;  %v1284_v42 = vperm.slane %v1276_v37, %v3593_v40  ;;  %v1226_v43 = vperm.slane %v1220_v38, %v3593_v40  ;;  %v1238_v44 = vsel %vm821_vm2, %v1230_v13, %v1237_v34 }
 0x1e4   : > { %v1295_v45 = vpack.c.bf16 %v1236_v41, %v1236_v41  ;;  %v1291_v46 = vrot.slane %v1272_v36, 4  ;;  %v1296_v47 = vpack.c.bf16 %v1238_v44, %v1238_v44  ;;  %v1268_v49 = vperm.slane %v1262_v39, %v3593_v40 }
 0x1e5   : > { %v1289_v25 = vrot.slane %v1284_v42, 4  ;;  %v1231_v50 = vrot.slane %v1226_v43, 4  ;;  %v1273_v48 = vrot.slane %v1260_v4, 4  ;;  %v1233_v11 = vrot.slane %v1214_v29, 4 }
 0x1e6   : > { %v1608_v51 = vsel %vm1565_vm3, %v1295_v45, 0  ;;  %v1627_v52 = vsel %vm1565_vm3, %v1296_v47, 0  ;;  %v1292_v12 = vsel %vm821_vm2, %v1284_v42, %v1291_v46  ;;  %v1004_v53 = vsel %vm821_vm2, %v1003_v10, %v3671_v9 }
 0x1e7   : > { %1617 = vmatpush.bf16.xpose.msra.mxu3 %v1608_v51  ;;  %v1290_v23 = vsel %vm821_vm2, %v1289_v25, %v1272_v36  ;;  %v1232_v54 = vsel %vm821_vm2, %v1231_v50, %v1214_v29  ;;  %1636 = vmatpush.bf16.xpose.msrb.mxu0 %v1627_v52  ;;  %v1274_v55 = vsel %vm821_vm2, %v1273_v48, %v1254_v63  ;;  %v1287_v56 = vrot.slane %v1268_v49, 4  ;;  %v2988_v50 = vld [vmem:[#allocation5] ss:$0 sm:$0xff] }
 0x1e8   : > { %v1299_v57 = vpack.c.bf16 %v1290_v23, %v1290_v23  ;;  %v1293_v58 = vpack.c.bf16 %v1232_v54, %v1232_v54  ;;  %v1280_v59 = vperm.slane %v1274_v55, %v3593_v40  ;;  %v1300_v60 = vpack.c.bf16 %v1292_v12, %v1292_v12 }
 0x1e9   : > { %v1234_v61 = vsel %vm821_vm2, %v1226_v43, %v1233_v11  ;;  %v1008_v2 = vperm.slane %v1004_v53, %v3569_v22  ;;  %v1023_v9 = vrot.slane %v3678_v15, 4  ;;  %v997_v5 = vperm.slane %v3675_v14, %v3569_v22 }
 0x1ea   : > { %v1684_v10 = vsel %vm1565_vm3, %v1299_v57, 0  ;;  %v1570_v62 = vsel %vm1565_vm3, %v1293_v58, 0  ;;  %v1285_v0 = vrot.slane %v1280_v59, 4  ;;  %v1703_v1 = vsel %vm1565_vm3, %v1300_v60, 0 }
 0x1eb   : > { %1579 = vmatpush.bf16.xpose.msra.mxu1 %v1570_v62  ;;  %v1294_v63 = vpack.c.bf16 %v1234_v61, %v1234_v61  ;;  %v1288_v3 = vsel %vm821_vm2, %v1280_v59, %v1287_v56  ;;  %v1011_v6 = vrot.slane %v3668_v8, 4  ;;  %v1043_v4 = vpack.c.bf16 %v3625_v26, %v3625_v26 }
 0x1ec   : > { %v1286_v7 = vsel %vm821_vm2, %v1285_v0, %v1268_v49  ;;  %v1298_v13 = vpack.c.bf16 %v1288_v3, %v1288_v3  ;;  %v1044_v19 = vpack.c.bf16 %v3628_v28, %v3628_v28  ;;  %v1024_v14 = vsel %vm821_vm2, %v1008_v2, %v1023_v9 }
 0x1ed   : > { %v1297_v16 = vpack.c.bf16 %v1286_v7, %v1286_v7  ;;  %v1589_v18 = vsel %vm1565_vm3, %v1294_v63, 0  ;;  %v1021_v21 = vrot.slane %v1008_v2, 4  ;;  %v1012_v26 = vsel %vm821_vm2, %v997_v5, %v1011_v6  ;;  %v2989_v2 = vld [vmem:[#allocation5 + $0x1] ss:$0 sm:$0xff] }
 0x1ee   : > { %1598 = vmatpush.bf16.xpose.msra.mxu2 %v1589_v18  ;;  %v1665_v20 = vsel %vm1565_vm3, %v1298_v13, 0  ;;  %2756 = vmatmul.msk.bf16.vlgmr.msra.gmra.mxu3 %vm1565_vm3, %v1043_v4  ;;  %v1041_v27 = vpack.c.bf16 %v3631_v30, %v3631_v30  ;;  %v1032_v28 = vperm.slane %v1024_v14, %v3593_v40  ;;  %v1009_v29 = vrot.slane %v997_v5, 4 }
 0x1ef   : > { %1693 = vmatpush.bf16.xpose.msrb.mxu3 %v1684_v10  ;;  %1712 = vmatpush.bf16.xpose.msra.mxu0 %v1703_v1  ;;  %v1646_v24 = vsel %vm1565_vm3, %v1297_v16, 0  ;;  %v1020_v34 = vperm.slane %v1012_v26, %v3593_v40  ;;  %v1022_v36 = vsel %vm821_vm2, %v1021_v21, %v3678_v15  ;;  %v1042_v37 = vpack.c.bf16 %v3634_v33, %v3634_v33 }
 0x1f0   : > { %2757 = vmatmul.msk.bf16.vlgmr.msrb.gmra.mxu0 %vm1565_vm3, %v1044_v19  ;;  %v1037_v38 = vrot.slane %v1032_v28, 4  ;;  %v1010_v39 = vsel %vm821_vm2, %v1009_v29, %v3668_v8  ;;  %v1028_v30 = vperm.slane %v1022_v36, %v3593_v40  ;;  %v1561_v48 = vrot.slane %v2988_v50, 3 }
 0x1f1   : > { %v1039_v41 = vrot.slane %v1020_v34, 4  ;;  %v1016_v42 = vperm.slane %v1010_v39, %v3593_v40  ;;  %v1560_v52 = vrot.slane %v2988_v50, 2  ;;  %v1726_v53 = vperm.slane %v2988_v50, 0 }
 0x1f2   : > { %2754 = vmatmul.msk.bf16.vlgmr.msra.gmra.mxu1 %vm1565_vm3, %v1041_v27  ;;  %v1038_v43 = vsel %vm821_vm2, %v1037_v38, %v1020_v34  ;;  %v1033_v44 = vrot.slane %v1028_v30, 4  ;;  %v1729_v11 = vperm.slane %v1561_v48, 0  ;;  %v1559_v61 = vrot.slane %v2988_v50, 1 }
 0x1f3   : > { %1655 = vmatpush.bf16.xpose.msrb.mxu1 %v1646_v24  ;;  %v1040_v45 = vsel %vm821_vm2, %v1032_v28, %v1039_v41  ;;  %v1047_v15 = vpack.c.bf16 %v1038_v43, %v1038_v43  ;;  %v1035_v46 = vrot.slane %v1016_v42, 4  ;;  %v1728_v56 = vperm.slane %v1560_v52, 0 }
 0x1f4   : > { %v1034_v33 = vsel %vm821_vm2, %v1033_v44, %v1016_v42  ;;  %v1048_v47 = vpack.c.bf16 %v1040_v45, %v1040_v45  ;;  %v1727_v63 = vperm.slane %v1559_v61, 0  ;;  %v1564_v3 = vrot.slane %v2989_v2, 3 }
 0x1f5   : > { %2755 = vmatmul.msk.bf16.vlgmr.msra.gmra.mxu2 %vm1565_vm3, %v1042_v37  ;;  %v1045_v8 = vpack.c.bf16 %v1034_v33, %v1034_v33  ;;  %v1036_v49 = vsel %vm821_vm2, %v1028_v30, %v1035_v46  ;;  %v1730_v14 = vperm.slane %v2989_v2, 0  ;;  %v1562_v38 = vrot.slane %v2989_v2, 1 }
 0x1f6   : > { %1674 = vmatpush.bf16.xpose.msrb.mxu2 %v1665_v20  ;;  %v1046_v25 = vpack.c.bf16 %v1036_v49, %v1036_v49  ;;  %v1733_v4 = vperm.slane %v1564_v3, 0  ;;  %v1563_v20 = vrot.slane %v2989_v2, 2 }
 0x1f7   : > { %v1731_v43 = vperm.slane %v1562_v38, 0 }
 0x1f8   : > { %v1732_v34 = vperm.slane %v1563_v20, 0 }
 0x1fe   : > { %2760 = vmatmul.msk.bf16.vlgmr.msrb.gmra.mxu3 %vm1565_vm3, %v1047_v15 }
 0x200   : > { %2761 = vmatmul.msk.bf16.vlgmr.msra.gmra.mxu0 %vm1565_vm3, %v1048_v47 }
 0x202   : > { %2758 = vmatmul.msk.bf16.vlgmr.msrb.gmra.mxu1 %vm1565_vm3, %v1045_v8 }
 0x205   : > { %2759 = vmatmul.msk.bf16.vlgmr.msrb.gmra.mxu2 %vm1565_vm3, %v1046_v25 }
 0x26d   : > { %v1638_v51 = vpop.f32.mrf.mxu0 }
 0x26e   : > { %v1721_v12 = vmul.f32 0.35355338, %v1638_v51 }
 0x26f   : > { %v1581_v23 = vpop.f32.mrf.mxu1 }
 0x270   : > { %v3807_v54 = vadd.f32 %v1729_v11, %v1721_v12  ;;  %v1718_v55 = vmul.f32 0.35355338, %v1581_v23 }
 0x271   : > { %v1619_v57 = vpop.f32.mrf.mxu3 }
 0x272   : > { %v1759_v58 = vsel %vm1565_vm3, %v3807_v54, -inf  ;;  %v1720_v59 = vmul.f32 0.35355338, %v1619_v57  ;;  %v1742_v60 = vadd.f32 %v1726_v53, %v1718_v55 }
 0x273   : > { %1760 = vmax.xlane.f32.xlu2 %v1759_v58 }
 0x274   : > { %v1750_v9 = vsel %vm1565_vm3, %v1742_v60, -inf  ;;  %v1744_v62 = vadd.f32 %v1728_v56, %v1720_v59 }
 0x275   : > { %v1640_v10 = vpop.f32.mrf.mxu0  ;;  %1751 = vmax.xlane.f32.xlu0 %v1750_v9 }
 0x276   : > { %v1756_v0 = vsel %vm1565_vm3, %v1744_v62, -inf }
 0x277   : > { %v1583_v1 = vpop.f32.mrf.mxu1  ;;  %1757 = vmax.xlane.f32.xlu1 %v1756_v0 }
 0x278   : > { %v1600_v5 = vpop.f32.mrf.mxu2 }
 0x279   : > { %v1719_v6 = vmul.f32 0.35355338, %v1600_v5  ;;  %v1621_v7 = vpop.f32.mrf.mxu3 }
 0x27b   : > { %v1743_v13 = vadd.f32 %v1727_v63, %v1719_v6 }
 0x27d   : > { %v1714_v16 = vpop.f32.mrf.mxu0  ;;  %v1753_v18 = vsel %vm1565_vm3, %v1743_v13, -inf }
 0x27e   : > { %v1725_v19 = vmul.f32 0.35355338, %v1714_v16  ;;  %1754 = vmax.xlane.f32.xlu2 %v1753_v18 }
 0x27f   : > { %v1657_v21 = vpop.f32.mrf.mxu1 }
 0x280   : > { %v3814_v24 = vadd.f32 %v1733_v4, %v1725_v19  ;;  %v1602_v26 = vpop.f32.mrf.mxu2  ;;  %v1722_v27 = vmul.f32 0.35355338, %v1657_v21 }
 0x281   : > { %v1695_v28 = vpop.f32.mrf.mxu3 }
 0x282   : > { %v1771_v29 = vsel %vm1565_vm3, %v3814_v24, -inf  ;;  %v1724_v36 = vmul.f32 0.35355338, %v1695_v28  ;;  %v1746_v37 = vadd.f32 %v1730_v14, %v1722_v27 }
 0x283   : > { %1772 = vmax.xlane.f32.xlu1 %v1771_v29 }
 0x284   : > { %v1762_v39 = vsel %vm1565_vm3, %v1746_v37, -inf  ;;  %v1748_v41 = vadd.f32 %v1732_v34, %v1724_v36 }
 0x285   : > { %v1716_v30 = vpop.f32.mrf.mxu0  ;;  %1763 = vmax.xlane.f32.xlu0 %v1762_v39 }
 0x286   : > { %v1768_v46 = vsel %vm1565_vm3, %v1748_v41, -inf }
 0x287   : > { %v1659_v42 = vpop.f32.mrf.mxu1 }
 0x288   : > { %v1676_v44 = vpop.f32.mrf.mxu2 }
 0x289   : > { %v1723_v45 = vmul.f32 0.35355338, %v1676_v44  ;;  %v1697_v15 = vpop.f32.mrf.mxu3 }
 0x28b   : > { %1769 = vmax.xlane.f32.xlu1 %v1768_v46  ;;  %v1747_v33 = vadd.f32 %v1731_v43, %v1723_v45 }
 0x28d   : > { %v1765_v47 = vsel %vm1565_vm3, %v1747_v33, -inf }
 0x28e   : > { %1766 = vmax.xlane.f32.xlu2 %v1765_v47 }
 0x290   : > { %v1678_v8 = vpop.f32.mrf.mxu2 }
 0x299   : > { %2958 = vrot.lane.b32.xlu0 %v3586_v35, %s3295_s12 }
 0x2a1   : > { %2968 = vrot.lane.b32.xlu0 %v3583_v32, %s3295_s12 }
 0x2a4   : > { %2963 = vrot.lane.b32.xlu1 %v3579_v31, %s3295_s12 }
 0x2a6   : > { %2953 = vrot.lane.b32.xlu2 %v3564_v17, %s3295_s12 }
 0x2e6   : > { %v1761_v49 = vpop.xlane.xlu2 %1760 }
 0x2e7   : > { %v1777_v52 = vsub.f32 %v3807_v54, %v1761_v49 }
 0x2e8   : > { %v1752_v25 = vpop.xlane.xlu0 %1751 }
 0x2e9   : > { %v1774_v50 = vsub.f32 %v1742_v60, %v1752_v25  ;;  %v1788_v53 = vmul.f32 1.442695, %v1777_v52 }
 0x2ea   : > { %v1758_v48 = vpop.xlane.xlu1 %1757 }
 0x2eb   : > { %v1782_v11 = vmul.f32 1.442695, %v1774_v50  ;;  %v1776_v51 = vsub.f32 %v1744_v62, %v1758_v48 }
 0x2ed   : > { %2997 = vpow2.f32 %v1782_v11  ;;  %v1786_v12 = vmul.f32 1.442695, %v1776_v51 }
 0x2ef   : > { %2999 = vpow2.f32 %v1786_v12 }
 0x2f0   : > { %3001 = vpow2.f32 %v1788_v53 }
 0x2f1   : > { %v1755_v23 = vpop.xlane.xlu2 %1754 }
 0x2f2   : > { %v1775_v35 = vsub.f32 %v1743_v13, %v1755_v23 }
 0x2f3   : > { %v3826_v55 = vpop.eup %2997 }
 0x2f4   : > { %v1784_v32 = vmul.f32 1.442695, %v1775_v35  ;;  %v1798_v17 = vsel %vm1565_vm3, %v3826_v55, 0.0 }
 0x2f5   : > { %v3830_v31 = vpop.eup %2999  ;;  %1799 = vadd.xlane.f32.xlu0 %v1798_v17 }
 0x2f6   : > { %v1773_v56 = vpop.xlane.xlu1 %1772  ;;  %3003 = vpow2.f32 %v1784_v32  ;;  %v1804_v54 = vsel %vm1565_vm3, %v3830_v31, 0.0  ;;  %v3834_v59 = vpop.eup %3001 }
 0x2f7   : > { %1805 = vadd.xlane.f32.xlu2 %v1804_v54  ;;  %v1807_v62 = vsel %vm1565_vm3, %v3834_v59, 0.0  ;;  %v1781_v0 = vsub.f32 %v3814_v24, %v1773_v56 }
 0x2f8   : > { %v1764_v57 = vpop.xlane.xlu0 %1763 }
 0x2f9   : > { %v1778_v58 = vsub.f32 %v1746_v37, %v1764_v57  ;;  %v1796_v6 = vmul.f32 1.442695, %v1781_v0 }
 0x2fb   : > { %v1790_v60 = vmul.f32 1.442695, %v1778_v58 }
 0x2fc   : > { %v3836_v61 = vpop.eup %3003 }
 0x2fd   : > { %3005 = vpow2.f32 %v1790_v60  ;;  %v1801_v2 = vsel %vm1565_vm3, %v3836_v61, 0.0 }
 0x2fe   : > { %v1770_v9 = vpop.xlane.xlu1 %1769  ;;  %1802 = vadd.xlane.f32.xlu1 %v1801_v2 }
 0x2ff   : > { %v1780_v10 = vsub.f32 %v1748_v41, %v1770_v9  ;;  %1808 = vadd.xlane.f32.xlu2 %v1807_v62 }
 0x301   : > { %v1794_v1 = vmul.f32 1.442695, %v1780_v10  ;;  %v1767_v63 = vpop.xlane.xlu2 %1766 }
 0x302   : > { %v1779_v3 = vsub.f32 %v1747_v33, %v1767_v63 }
 0x303   : > { %3007 = vpow2.f32 %v1794_v1  ;;  %v3843_v5 = vpop.eup %3005 }
 0x304   : > { %v1792_v7 = vmul.f32 1.442695, %v1779_v3  ;;  %v1810_v13 = vsel %vm1565_vm3, %v3843_v5, 0.0 }
 0x306   : > { %3009 = vpow2.f32 %v1792_v7 }
 0x307   : > { %3011 = vpow2.f32 %v1796_v6  ;;  %1811 = vadd.xlane.f32.xlu2 %v1810_v13 }
 0x309   : > { %v3847_v4 = vpop.eup %3007  ;;  %v2954_v16 = vpop.permute.xlu2 %2953 }
 0x30a   : > { %v1816_v18 = vsel %vm1565_vm3, %v3847_v4, 0.0  ;;  %v2956_v19 = vunpack.i.h.bf16 %v2954_v16  ;;  %v2955_v20 = vunpack.i.l.bf16 %v2954_v16 }
 0x30b   : > { %1817 = vadd.xlane.f32.xlu1 %v1816_v18  ;;  %v2959_v14 = vpop.permute.xlu0 %2958 }
 0x30c   : > { %v3851_v21 = vpop.eup %3009  ;;  %v1339_v24 = vrot.slane %v2956_v19, 4  ;;  %v1327_v26 = vrot.slane %v2955_v20, 4  ;;  %v2961_v27 = vunpack.i.h.bf16 %v2959_v14  ;;  %v2960_v28 = vunpack.i.l.bf16 %v2959_v14 }
 0x30d   : > { %v3853_v29 = vpop.eup %3011  ;;  %v1813_v34 = vsel %vm1565_vm3, %v3851_v21, 0.0 }
 0x30e   : > { %v1337_v36 = vrot.slane %v2961_v27, 4  ;;  %v1340_v37 = vsel %vm821_vm2, %v2961_v27, %v1339_v24  ;;  %v1325_v38 = vrot.slane %v2960_v28, 4  ;;  %v1328_v39 = vsel %vm821_vm2, %v2960_v28, %v1327_v26  ;;  %1814 = vadd.xlane.f32.xlu0 %v1813_v34 }
 0x30f   : > { %v1348_v30 = vperm.slane %v1340_v37, %v3569_v22  ;;  %v1336_v41 = vperm.slane %v1328_v39, %v3569_v22  ;;  %v1819_v44 = vsel %vm1565_vm3, %v3853_v29, 0.0 }
 0x310   : > { %v1338_v42 = vsel %vm821_vm2, %v1337_v36, %v2956_v19  ;;  %v1326_v43 = vsel %vm821_vm2, %v1325_v38, %v2955_v20 }
 0x311   : > { %v1344_v45 = vperm.slane %v1338_v42, %v3569_v22  ;;  %v1361_v15 = vrot.slane %v1348_v30, 4  ;;  %v1332_v46 = vperm.slane %v1326_v43, %v3569_v22  ;;  %v1363_v33 = vrot.slane %v1336_v41, 4 }
 0x313   : > { %1820 = vadd.xlane.f32.xlu1 %v1819_v44  ;;  %v1349_v47 = vrot.slane %v1344_v45, 4  ;;  %v1351_v8 = vrot.slane %v1332_v46, 4  ;;  %v1362_v49 = vsel %vm821_vm2, %v1361_v15, %v1336_v41  ;;  %v1364_v25 = vsel %vm821_vm2, %v1348_v30, %v1363_v33  ;;  %v2969_v50 = vpop.permute.xlu0 %2968 }
 0x314   : > { %v1368_v48 = vperm.slane %v1362_v49, %v3593_v40  ;;  %v1372_v11 = vperm.slane %v1364_v25, %v3593_v40  ;;  %v2971_v51 = vunpack.i.h.bf16 %v2969_v50  ;;  %v2970_v52 = vunpack.i.l.bf16 %v2969_v50 }
 0x315   : > { %v1350_v12 = vsel %vm821_vm2, %v1349_v47, %v1332_v46  ;;  %v1352_v53 = vsel %vm821_vm2, %v1344_v45, %v1351_v8 }
 0x316   : > { %v2964_v23 = vpop.permute.xlu1 %2963  ;;  %v1356_v35 = vperm.slane %v1350_v12, %v3593_v40  ;;  %v1360_v32 = vperm.slane %v1352_v53, %v3593_v40  ;;  %v1377_v17 = vrot.slane %v1368_v48, 4  ;;  %v1379_v56 = vrot.slane %v1372_v11, 4 }
 0x317   : > { %v1393_v54 = vrot.slane %v2971_v51, 4  ;;  %v1381_v57 = vrot.slane %v2970_v52, 4  ;;  %v2966_v58 = vunpack.i.h.bf16 %v2964_v23  ;;  %v2965_v60 = vunpack.i.l.bf16 %v2964_v23 }
 0x318   : > { %v1373_v2 = vrot.slane %v1356_v35, 4  ;;  %v1375_v9 = vrot.slane %v1360_v32, 4  ;;  %v1378_v10 = vsel %vm821_vm2, 0.0, %v1377_v17  ;;  %v1380_v62 = vsel %vm821_vm2, 0.0, %v1379_v56 }
 0x319   : > { %v1448_v0 = vsel %vm821_vm2, %v1379_v56, %v1368_v48  ;;  %v1453_v1 = vrot.slane %v1380_v62, 4  ;;  %v1395_v63 = vrot.slane %v2966_v58, 4  ;;  %v1382_v3 = vsel %vm821_vm2, %v1381_v57, %v2965_v60 }
 0x31a   : > { %v1374_v6 = vsel %vm821_vm2, 0.0, %v1373_v2  ;;  %v1376_v7 = vsel %vm821_vm2, 0.0, %v1375_v9  ;;  %v1452_v13 = vperm.slane %v1448_v0, %v3569_v22  ;;  %v1383_v16 = vrot.slane %v2965_v60, 4 }
 0x31b   : > { %v1442_v18 = vrot.slane %v1376_v7, 4  ;;  %v1388_v19 = vperm.slane %v1382_v3, %v3569_v22  ;;  %v1394_v20 = vsel %vm821_vm2, %v1393_v54, %v2966_v58  ;;  %v1396_v14 = vsel %vm821_vm2, %v2971_v51, %v1395_v63 }
 0x31c   : > { %v1384_v24 = vsel %vm821_vm2, %v2970_v52, %v1383_v16  ;;  %v1400_v26 = vperm.slane %v1394_v20, %v3569_v22  ;;  %v1404_v27 = vperm.slane %v1396_v14, %v3569_v22  ;;  %v1437_v28 = vsel %vm821_vm2, %v1375_v9, %v1356_v35 }
 0x31d   : > { %v1392_v34 = vperm.slane %v1384_v24, %v3569_v22  ;;  %v1407_v36 = vrot.slane %v1388_v19, 4  ;;  %v1441_v37 = vperm.slane %v1437_v28, %v3569_v22  ;;  %v1443_v38 = vsel %vm821_vm2, %v1442_v18, %v1374_v6 }
 0x31e   : > { %v1405_v39 = vrot.slane %v1400_v26, 4  ;;  %v1417_v30 = vrot.slane %v1404_v27, 4  ;;  %v1447_v41 = vperm.slane %v1443_v38, %v3569_v22  ;;  %v1454_v42 = vsel %vm821_vm2, %v1453_v1, %v1378_v10 }
 0x31f   : > { %v1408_v43 = vsel %vm821_vm2, %v1400_v26, %v1407_v36  ;;  %v1419_v44 = vrot.slane %v1392_v34, 4  ;;  %v1458_v45 = vperm.slane %v1454_v42, %v3569_v22  ;;  %v1461_v15 = vrot.slane %v1441_v37, 4 }
 0x320   : > { %v1406_v46 = vsel %vm821_vm2, %v1405_v39, %v1388_v19  ;;  %v1416_v33 = vperm.slane %v1408_v43, %v3593_v40  ;;  %v1418_v47 = vsel %vm821_vm2, %v1417_v30, %v1392_v34  ;;  %v1473_v8 = vrot.slane %v1452_v13, 4 }
 0x321   : > { %v1412_v49 = vperm.slane %v1406_v46, %v3593_v40  ;;  %v1420_v25 = vsel %vm821_vm2, %v1404_v27, %v1419_v44  ;;  %v1424_v50 = vperm.slane %v1418_v47, %v3593_v40  ;;  %v1462_v48 = vsel %vm821_vm2, %v1447_v41, %v1461_v15 }
 0x322   : > { %v1428_v11 = vperm.slane %v1420_v25, %v3593_v40  ;;  %v1431_v51 = vrot.slane %v1416_v33, 4  ;;  %v1470_v52 = vperm.slane %v1462_v48, %v3593_v40  ;;  %v1474_v12 = vsel %vm821_vm2, %v1458_v45, %v1473_v8 }
 0x323   : > { %v1429_v53 = vrot.slane %v1412_v49, 4  ;;  %v1433_v23 = vrot.slane %v1424_v50, 4  ;;  %v1482_v35 = vperm.slane %v1474_v12, %v3593_v40  ;;  %v1459_v32 = vrot.slane %v1447_v41, 4 }
 0x324   : > { %v1432_v17 = vsel %vm821_vm2, 0.0, %v1431_v51  ;;  %v1435_v56 = vrot.slane %v1428_v11, 4  ;;  %v1491_v54 = vsel %vm821_vm2, %v1431_v51, %v1412_v49  ;;  %v1471_v57 = vrot.slane %v1458_v45, 4 }
 0x325   : > { %v1430_v58 = vsel %vm821_vm2, 0.0, %v1429_v53  ;;  %v1434_v60 = vsel %vm821_vm2, 0.0, %v1433_v23  ;;  %v1495_v2 = vperm.slane %v1491_v54, %v3569_v22  ;;  %v1496_v9 = vrot.slane %v1432_v17, 4 }
 0x326   : > { %v1436_v10 = vsel %vm821_vm2, 0.0, %v1435_v56  ;;  %v1487_v62 = vrot.slane %v1482_v35, 4  ;;  %v1460_v0 = vsel %vm821_vm2, %v1459_v32, %v1441_v37  ;;  %v1472_v1 = vsel %vm821_vm2, %v1471_v57, %v1452_v13 }
 0x327   : > { %v1507_v63 = vrot.slane %v1436_v10, 4  ;;  %v1466_v3 = vperm.slane %v1460_v0, %v3593_v40  ;;  %v1478_v6 = vperm.slane %v1472_v1, %v3593_v40  ;;  %v1489_v7 = vrot.slane %v1470_v52, 4 }
 0x328   : > { %v1488_v16 = vsel %vm821_vm2, %v1487_v62, %v1470_v52  ;;  %v1497_v18 = vsel %vm821_vm2, %v1496_v9, %v1430_v58  ;;  %v1502_v19 = vsel %vm821_vm2, %v1435_v56, %v1424_v50  ;;  %v1515_v20 = vrot.slane %v1495_v2, 4 }
 0x329   : > { %v1547_v14 = vpack.c.bf16 %v1488_v16, %v1488_v16  ;;  %v1483_v24 = vrot.slane %v1478_v6, 4  ;;  %v1490_v26 = vsel %vm821_vm2, %v1482_v35, %v1489_v7  ;;  %v1485_v27 = vrot.slane %v1466_v3, 4 }
 0x32a   : > { %v1548_v28 = vpack.c.bf16 %v1490_v26, %v1490_v26  ;;  %v1501_v13 = vperm.slane %v1497_v18, %v3569_v22  ;;  %v1506_v34 = vperm.slane %v1502_v19, %v3569_v22  ;;  %v1508_v36 = vsel %vm821_vm2, %v1507_v63, %v1434_v60 }
 0x32b   : > { %v1889_v37 = vsel %vm1849_vm4, %v1547_v14, 0  ;;  %v1484_v38 = vsel %vm821_vm2, %v1483_v24, %v1466_v3  ;;  %v1486_v39 = vsel %vm821_vm2, %v1478_v6, %v1485_v27  ;;  %v1512_v30 = vperm.slane %v1508_v36, %v3569_v22 }
 0x32c   : > { %1898 = vmatpush.bf16.msra.mxu3 %v1889_v37  ;;  %v1545_v41 = vpack.c.bf16 %v1484_v38, %v1484_v38  ;;  %v1908_v42 = vsel %vm1849_vm4, %v1548_v28, 0  ;;  %v1546_v43 = vpack.c.bf16 %v1486_v39, %v1486_v39  ;;  %v1516_v44 = vsel %vm821_vm2, %v1501_v13, %v1515_v20 }
 0x32d   : > { %1917 = vmatpush.bf16.msrb.mxu0 %v1908_v42  ;;  %v1524_v45 = vperm.slane %v1516_v44, %v3593_v40  ;;  %v1527_v15 = vrot.slane %v1506_v34, 4  ;;  %v1513_v46 = vrot.slane %v1501_v13, 4  ;;  %v1525_v33 = vrot.slane %v1512_v30, 4 }
 0x32e   : > { %v1851_v47 = vsel %vm1849_vm4, %v1545_v41, 0  ;;  %v1870_v8 = vsel %vm1849_vm4, %v1546_v43, 0 }
 0x32f   : > { %1860 = vmatpush.bf16.msra.mxu1 %v1851_v47  ;;  %1879 = vmatpush.bf16.msra.mxu2 %v1870_v8  ;;  %v1528_v49 = vsel %vm821_vm2, %v1512_v30, %v1527_v15  ;;  %v1543_v25 = vrot.slane %v1524_v45, 4  ;;  %v1514_v50 = vsel %vm821_vm2, %v1513_v46, %v1495_v2  ;;  %v1526_v48 = vsel %vm821_vm2, %v1525_v33, %v1506_v34 }
 0x330   : > { %v1536_v11 = vperm.slane %v1528_v49, %v3593_v40  ;;  %v1520_v51 = vperm.slane %v1514_v50, %v3593_v40  ;;  %v1532_v52 = vperm.slane %v1526_v48, %v3593_v40 }
 0x332   : > { %v1544_v12 = vsel %vm821_vm2, %v1536_v11, %v1543_v25  ;;  %v1539_v53 = vrot.slane %v1520_v51, 4  ;;  %v1541_v23 = vrot.slane %v1536_v11, 4  ;;  %v1537_v35 = vrot.slane %v1532_v52, 4 }
 0x333   : > { %v1552_v32 = vpack.c.bf16 %v1544_v12, %v1544_v12 }
 0x334   : > { %v1540_v17 = vsel %vm821_vm2, %v1532_v52, %v1539_v53  ;;  %v1542_v56 = vsel %vm821_vm2, %v1541_v23, %v1524_v45  ;;  %v1538_v54 = vsel %vm821_vm2, %v1537_v35, %v1520_v51 }
 0x335   : > { %v1984_v57 = vsel %vm1849_vm4, %v1552_v32, 0  ;;  %v1550_v58 = vpack.c.bf16 %v1540_v17, %v1540_v17  ;;  %v1551_v60 = vpack.c.bf16 %v1542_v56, %v1542_v56  ;;  %v1549_v2 = vpack.c.bf16 %v1538_v54, %v1538_v54 }
 0x336   : > { %1993 = vmatpush.bf16.msra.mxu0 %v1984_v57 }
 0x337   : > { %v1946_v9 = vsel %vm1849_vm4, %v1550_v58, 0  ;;  %v1965_v10 = vsel %vm1849_vm4, %v1551_v60, 0  ;;  %v1927_v62 = vsel %vm1849_vm4, %v1549_v2, 0 }
 0x338   : > { %1955 = vmatpush.bf16.msrb.mxu2 %v1946_v9  ;;  %1974 = vmatpush.bf16.msrb.mxu3 %v1965_v10 }
 0x339   : > { %1936 = vmatpush.bf16.msrb.mxu1 %v1927_v62 }
 0x368   : > { %v1800_v0 = vpop.xlane.xlu0 %1799 }
 0x369   : > { %3013 = vrcp.f32 %v1800_v0 }
 0x36a   : > { %v1806_v1 = vpop.xlane.xlu2 %1805 }
 0x36b   : > { %3015 = vrcp.f32 %v1806_v1 }
 0x36f   : > { %v3014_v63 = vpop.eup %3013 }
 0x370   : > { %v1830_v3 = vmul.f32 %v3014_v63, %v3826_v55 }
 0x371   : > { %v3016_v6 = vpop.eup %3015  ;;  %v1803_v7 = vpop.xlane.xlu1 %1802 }
 0x372   : > { %v1838_v16 = vpack.c.bf16 %v1830_v3, %v1830_v3  ;;  %v1832_v18 = vmul.f32 %v3016_v6, %v3830_v31  ;;  %3017 = vrcp.f32 %v1803_v7  ;;  %v1809_v19 = vpop.xlane.xlu2 %1808 }
 0x373   : > { %3019 = vrcp.f32 %v1809_v19 }
 0x374   : > { %v1840_v20 = vpack.c.bf16 %v1832_v18, %v1832_v18  ;;  %2762 = vmatmul.msk.bf16.vlgmr.msra.gmra.mxu1 %vm1565_vm3, %v1838_v16 }
 0x376   : > { %2764 = vmatmul.msk.bf16.vlgmr.msra.gmra.mxu3 %vm1565_vm3, %v1840_v20 }
 0x378   : > { %v3018_v14 = vpop.eup %3017 }
 0x379   : > { %v3020_v24 = vpop.eup %3019  ;;  %v1831_v26 = vmul.f32 %v3018_v14, %v3836_v61 }
 0x37a   : > { %v1833_v27 = vmul.f32 %v3020_v24, %v3834_v59  ;;  %v1812_v55 = vpop.xlane.xlu2 %1811 }
 0x37b   : > { %v1839_v28 = vpack.c.bf16 %v1831_v26, %v1831_v26  ;;  %3021 = vrcp.f32 %v1812_v55 }
 0x37c   : > { %v1841_v13 = vpack.c.bf16 %v1833_v27, %v1833_v27 }
 0x37d   : > { %2763 = vmatmul.msk.bf16.vlgmr.msra.gmra.mxu2 %vm1565_vm3, %v1839_v28 }
 0x37e   : > { %v1818_v31 = vpop.xlane.xlu1 %1817  ;;  %2765 = vmatmul.msk.bf16.vlgmr.msrb.gmra.mxu0 %vm1565_vm3, %v1841_v13 }
 0x37f   : > { %3023 = vrcp.f32 %v1818_v31 }
 0x381   : > { %v3022_v34 = vpop.eup %3021  ;;  %v1815_v36 = vpop.xlane.xlu0 %1814 }
 0x382   : > { %v1834_v37 = vmul.f32 %v3022_v34, %v3843_v5  ;;  %3025 = vrcp.f32 %v1815_v36 }
 0x384   : > { %v1842_v39 = vpack.c.bf16 %v1834_v37, %v1834_v37 }
 0x385   : > { %v3024_v38 = vpop.eup %3023 }
 0x386   : > { %v1836_v61 = vmul.f32 %v3024_v38, %v3847_v4  ;;  %v1821_v59 = vpop.xlane.xlu1 %1820  ;;  %2766 = vmatmul.msk.bf16.vlgmr.msrb.gmra.mxu1 %vm1565_vm3, %v1842_v39 }
 0x387   : > { %3027 = vrcp.f32 %v1821_v59 }
 0x388   : > { %v1844_v30 = vpack.c.bf16 %v1836_v61, %v1836_v61  ;;  %v3026_v41 = vpop.eup %3025 }
 0x389   : > { %v1835_v42 = vmul.f32 %v3026_v41, %v3851_v21 }
 0x38a   : > { %2768 = vmatmul.msk.bf16.vlgmr.msrb.gmra.mxu3 %vm1565_vm3, %v1844_v30 }
 0x38b   : > { %v1843_v43 = vpack.c.bf16 %v1835_v42, %v1835_v42 }
 0x38d   : > { %v3028_v44 = vpop.eup %3027  ;;  %2767 = vmatmul.msk.bf16.vlgmr.msrb.gmra.mxu2 %vm1565_vm3, %v1843_v43 }
 0x38e   : > { %v1837_v45 = vmul.f32 %v3028_v44, %v3853_v29 }
 0x390   : > { %v1845_v5 = vpack.c.bf16 %v1837_v45, %v1837_v45 }
 0x392   : > { %2769 = vmatmul.msk.bf16.vlgmr.msra.gmra.mxu0 %vm1565_vm3, %v1845_v5 }
 0x3f1   : > { %v1862_v4 = vpop.f32.mrf.mxu1 }
 0x3f2   : > { %v2001_v47 = vrot.slane %v1862_v4, 4 }
 0x3f9   : > { %v1864_v15 = vpop.f32.mrf.mxu1  ;;  %v1900_v46 = vpop.f32.mrf.mxu3 }
 0x3fa   : > { %v1999_v33 = vrot.slane %v1900_v46, 4  ;;  %v2002_v21 = vsel %vm821_vm2, %v1900_v46, %v2001_v47 }
 0x3fb   : > { %v1919_v8 = vpop.f32.mrf.mxu0  ;;  %v2010_v29 = vperm.slane %v2002_v21, %v3569_v22 }
 0x3fc   : > { %v2000_v49 = vsel %vm821_vm2, %v1999_v33, %v1862_v4  ;;  %v2011_v50 = vrot.slane %v1919_v8, 4 }
 0x3fd   : > { %v2006_v25 = vperm.slane %v2000_v49, %v3569_v22  ;;  %v2037_v17 = vrot.slane %v2010_v29, 4 }
 0x3ff   : > { %v2025_v48 = vrot.slane %v2006_v25, 4 }
 0x400   : > { %v1881_v11 = vpop.f32.mrf.mxu2 }
 0x401   : > { %v2012_v51 = vsel %vm821_vm2, %v2011_v50, %v1881_v11  ;;  %v2013_v52 = vrot.slane %v1881_v11, 4  ;;  %v1902_v12 = vpop.f32.mrf.mxu3 }
 0x402   : > { %v2018_v53 = vperm.slane %v2012_v51, %v3569_v22 }
 0x403   : > { %v2014_v23 = vsel %vm821_vm2, %v1919_v8, %v2013_v52  ;;  %v1921_v35 = vpop.f32.mrf.mxu0  ;;  %v1938_v32 = vpop.f32.mrf.mxu1 }
 0x404   : > { %v2022_v56 = vperm.slane %v2014_v23, %v3569_v22  ;;  %v2023_v54 = vrot.slane %v2018_v53, 4  ;;  %v2026_v57 = vsel %vm821_vm2, %v2018_v53, %v2025_v48  ;;  %v2057_v26 = vrot.slane %v1938_v32, 4 }
 0x405   : > { %v2034_v58 = vperm.slane %v2026_v57, %v3593_v40 }
 0x406   : > { %v2024_v60 = vsel %vm821_vm2, %v2023_v54, %v2006_v25  ;;  %v2035_v2 = vrot.slane %v2022_v56, 4  ;;  %v2038_v9 = vsel %vm821_vm2, %v2022_v56, %v2037_v17 }
 0x407   : > { %v2030_v10 = vperm.slane %v2024_v60, %v3593_v40  ;;  %v2046_v62 = vperm.slane %v2038_v9, %v3593_v40  ;;  %v2049_v0 = vrot.slane %v2034_v58, 4 }
 0x408   : > { %v2036_v1 = vsel %vm821_vm2, %v2035_v2, %v2010_v29  ;;  %v1883_v63 = vpop.f32.mrf.mxu2 }
 0x409   : > { %v2042_v3 = vperm.slane %v2036_v1, %v3593_v40  ;;  %v2047_v6 = vrot.slane %v2030_v10, 4  ;;  %v2050_v7 = vsel %vm821_vm2, 0.0, %v2049_v0  ;;  %v2053_v16 = vrot.slane %v2046_v62, 4 }
 0x40a   : > { %v2111_v18 = vsel %vm821_vm2, %v2049_v0, %v2030_v10  ;;  %v2116_v19 = vrot.slane %v2050_v7, 4 }
 0x40b   : > { %v2048_v20 = vsel %vm821_vm2, 0.0, %v2047_v6  ;;  %v2051_v14 = vrot.slane %v2042_v3, 4  ;;  %v2054_v24 = vsel %vm821_vm2, 0.0, %v2053_v16  ;;  %v1940_v27 = vpop.f32.mrf.mxu1  ;;  %v2115_v55 = vperm.slane %v2111_v18, %v3569_v22 }
 0x40c   : > { %v2117_v28 = vsel %vm821_vm2, %v2116_v19, %v2048_v20  ;;  %v2122_v13 = vsel %vm821_vm2, %v2053_v16, %v2042_v3  ;;  %v2127_v31 = vrot.slane %v2054_v24, 4 }
 0x40d   : > { %v1976_v34 = vpop.f32.mrf.mxu3  ;;  %v2052_v36 = vsel %vm821_vm2, 0.0, %v2051_v14  ;;  %v2126_v37 = vperm.slane %v2122_v13, %v3569_v22  ;;  %v2121_v30 = vperm.slane %v2117_v28, %v3569_v22  ;;  %v2135_v46 = vrot.slane %v2115_v55, 4 }
 0x40e   : > { %v2055_v38 = vrot.slane %v1976_v34, 4  ;;  %v2058_v39 = vsel %vm821_vm2, %v1976_v34, %v2057_v26  ;;  %v2128_v41 = vsel %vm821_vm2, %v2127_v31, %v2052_v36 }
 0x40f   : > { %v2066_v61 = vperm.slane %v2058_v39, %v3569_v22  ;;  %v1995_v59 = vpop.f32.mrf.mxu0  ;;  %v2132_v44 = vperm.slane %v2128_v41, %v3569_v22  ;;  %v2147_v33 = vrot.slane %v2126_v37, 4  ;;  %v2133_v21 = vrot.slane %v2121_v30, 4 }
 0x410   : > { %v2056_v42 = vsel %vm821_vm2, %v2055_v38, %v1938_v32  ;;  %v2067_v43 = vrot.slane %v1995_v59, 4  ;;  %v1957_v45 = vpop.f32.mrf.mxu2  ;;  %v2136_v12 = vsel %vm821_vm2, %v2121_v30, %v2135_v46 }
 0x411   : > { %v2062_v5 = vperm.slane %v2056_v42, %v3569_v22  ;;  %v2069_v4 = vrot.slane %v1957_v45, 4  ;;  %v2093_v8 = vrot.slane %v2066_v61, 4  ;;  %v2145_v50 = vrot.slane %v2132_v44, 4 }
 0x412   : > { %v2068_v15 = vsel %vm821_vm2, %v2067_v43, %v1957_v45  ;;  %v2148_v53 = vsel %vm821_vm2, %v2132_v44, %v2147_v33  ;;  %v2134_v54 = vsel %vm821_vm2, %v2133_v21, %v2115_v55  ;;  %v2144_v62 = vperm.slane %v2136_v12, %v3593_v40 }
 0x413   : > { %v2081_v47 = vrot.slane %v2062_v5, 4  ;;  %v2074_v49 = vperm.slane %v2068_v15, %v3569_v22  ;;  %v2070_v25 = vsel %vm821_vm2, %v1995_v59, %v2069_v4  ;;  %v2146_v23 = vsel %vm821_vm2, %v2145_v50, %v2126_v37 }
 0x414   : > { %v2078_v29 = vperm.slane %v2070_v25, %v3569_v22  ;;  %v2152_v2 = vperm.slane %v2146_v23, %v3593_v40  ;;  %v2156_v0 = vperm.slane %v2148_v53, %v3593_v40  ;;  %v2140_v18 = vperm.slane %v2134_v54, %v3593_v40  ;;  %v2816_v23 = vld [vmem:[%s3522_s18 + $0x8] sm:$0xff] }
 0x415   : > { %v2079_v48 = vrot.slane %v2074_v49, 4  ;;  %v2082_v11 = vsel %vm821_vm2, %v2074_v49, %v2081_v47  ;;  %v1978_v51 = vpop.f32.mrf.mxu3  ;;  %v2163_v42 = vrot.slane %v2144_v62, 4  ;;  %2281 = vmatpush.bf16.msra.mxu1 %v2816_v23 }
 0x416   : > { %v2090_v52 = vperm.slane %v2082_v11, %v3593_v40  ;;  %v2091_v32 = vrot.slane %v2078_v29, 4  ;;  %v2094_v17 = vsel %vm821_vm2, %v2078_v29, %v2093_v8  ;;  %v2157_v19 = vrot.slane %v2152_v2, 4 }
 0x417   : > { %v2080_v35 = vsel %vm821_vm2, %v2079_v48, %v2062_v5  ;;  %v1997_v56 = vpop.f32.mrf.mxu0  ;;  %v2102_v58 = vperm.slane %v2094_v17, %v3593_v40  ;;  %v2161_v30 = vrot.slane %v2156_v0, 4  ;;  %v2159_v43 = vrot.slane %v2140_v18, 4 }
 0x418   : > { %v2086_v57 = vperm.slane %v2080_v35, %v3593_v40  ;;  %v2105_v60 = vrot.slane %v2090_v52, 4  ;;  %v2092_v9 = vsel %vm821_vm2, %v2091_v32, %v2066_v61  ;;  %v1959_v10 = vpop.f32.mrf.mxu2  ;;  %v2158_v36 = vsel %vm821_vm2, %v2157_v19, %v2140_v18  ;;  %v2815_v35 = vld [vmem:[%s3522_s18] sm:$0xff]  ;;  %v3039_v19 = vld [vmem:[#allocation10] sm:$0xff] }
 0x419   : > { %v2098_v1 = vperm.slane %v2092_v9, %v3593_v40  ;;  %v2109_v6 = vrot.slane %v2102_v58, 4  ;;  %v2162_v21 = vsel %vm821_vm2, %v2161_v30, %v2144_v62  ;;  %v2164_v25 = vsel %vm821_vm2, %v2156_v0, %v2163_v42  ;;  %2282 = vmatpush.bf16.msra.mxu1 %v2815_v35 }
 0x41a   : > { %v2103_v63 = vrot.slane %v2086_v57, 4  ;;  %v2106_v3 = vsel %vm821_vm2, 0.0, %v2105_v60  ;;  %v2165_v7 = vsel %vm821_vm2, %v2105_v60, %v2086_v57  ;;  %v2160_v29 = vsel %vm821_vm2, %v2152_v2, %v2159_v43 }
 0x41b   : > { %v2170_v16 = vrot.slane %v2106_v3, 4  ;;  %v2107_v20 = vrot.slane %v2098_v1, 4  ;;  %v2110_v14 = vsel %vm821_vm2, 0.0, %v2109_v6  ;;  %v2176_v24 = vsel %vm821_vm2, %v2109_v6, %v2098_v1 }
 0x41c   : > { %v2104_v26 = vsel %vm821_vm2, 0.0, %v2103_v63  ;;  %v2180_v27 = vperm.slane %v2176_v24, %v3569_v22  ;;  %v2181_v55 = vrot.slane %v2110_v14, 4  ;;  %v2169_v28 = vperm.slane %v2165_v7, %v3569_v22  ;;  %v2990_v7 = vld [vmem:[%s4181_s27] ss:$0 sm:$0xff] }
 0x41d   : > { %v2171_v13 = vsel %vm821_vm2, %v2170_v16, %v2104_v26  ;;  %v2108_v31 = vsel %vm821_vm2, 0.0, %v2107_v20 }
 0x41e   : > { %v2175_v34 = vperm.slane %v2171_v13, %v3569_v22  ;;  %v2182_v37 = vsel %vm821_vm2, %v2181_v55, %v2108_v31  ;;  %v2201_v38 = vrot.slane %v2180_v27, 4  ;;  %v2189_v39 = vrot.slane %v2169_v28, 4 }
 0x41f   : > { %v2186_v61 = vperm.slane %v2182_v37, %v3569_v22  ;;  %v3299_v13 = vmov 32.0  }
 0x420   : > { %v2187_v59 = vrot.slane %v2175_v34, 4  ;;  %v2190_v41 = vsel %vm821_vm2, %v2175_v34, %v2189_v39  ;;  %3029 = vrcp.f32 %v3299_v13 }
 0x421   : > { %v2198_v44 = vperm.slane %v2190_v41, %v3593_v40  ;;  %v2202_v45 = vsel %vm821_vm2, %v2186_v61, %v2201_v38  ;;  %v2199_v4 = vrot.slane %v2186_v61, 4 }
 0x422   : > { %v2188_v5 = vsel %vm821_vm2, %v2187_v59, %v2169_v28  ;;  %v2210_v15 = vperm.slane %v2202_v45, %v3593_v40 }
 0x423   : > { %v2194_v46 = vperm.slane %v2188_v5, %v3593_v40  ;;  %v2217_v33 = vrot.slane %v2198_v44, 4  ;;  %v2200_v22 = vsel %vm821_vm2, %v2199_v4, %v2180_v27  ;;  %v3040_v27 = vld [vmem:[#allocation10 + $0x8] sm:$0xff] }
 0x424   : > { %v2215_v47 = vrot.slane %v2210_v15, 4  ;;  %v2206_v8 = vperm.slane %v2200_v22, %v3593_v40  ;;  %v2818_v22 = vld [vmem:[%s3531_s3 + $0x8] sm:$0xff] }
 0x425   : > { %v2213_v49 = vrot.slane %v2194_v46, 4  ;;  %v2218_v50 = vsel %vm821_vm2, %v2210_v15, %v2217_v33  ;;  %2384 = vmatpush.bf16.msra.mxu2 %v2818_v22 }
 0x426   : > { %v2216_v48 = vsel %vm821_vm2, %v2215_v47, %v2198_v44  ;;  %v2982_v11 = vpack.i.bf16 %v2218_v50, %v2164_v25  ;;  %v2211_v51 = vrot.slane %v2206_v8, 4  ;;  %v3030_v31 = vpop.eup %3029  ;;  %v2817_v47 = vld [vmem:[%s3531_s3] sm:$0xff] }
 0x427   : > { %v2214_v52 = vsel %vm821_vm2, %v2206_v8, %v2213_v49  ;;  %v2977_v12 = vpack.i.bf16 %v2216_v48, %v2162_v21  ;;  %v2300_v34 = vmul.f32 32.0, %v3030_v31  ;;  %vm2304_vm7 = vweird.f32 %v3030_v31 }
 0x428   : > { %v2972_v53 = vpack.i.bf16 %v2214_v52, %v2160_v29  ;;  %2983 = vrot.lane.b32.xlu1 %v2982_v11, %s3296_s22  ;;  %v2212_v40 = vsel %vm821_vm2, %v2211_v51, %v2194_v46 }
 0x429   : > { %2978 = vrot.lane.b32.xlu2 %v2977_v12, %s3297_s14  ;;  %2385 = vmatpush.bf16.msra.mxu2 %v2817_v47 }
 0x42a   : > { %2973 = vrot.lane.b32.xlu0 %v2972_v53, %s3298_s10 }
 0x483   : > { %v2979_v32 = vpop.permute.xlu2 %2978 }
 0x484   : > { %v2981_v58 = vunpack.i.h.bf16 %v2979_v32  ;;  %v2980_v60 = vunpack.i.l.bf16 %v2979_v32  ;;  %v2991_v32 = vld [vmem:[%s4182_s29] ss:$0 sm:$0xff] }
 0x49a   : > { %v2984_v17 = vpop.permute.xlu1 %2983 }
 0x49b   : > { %v2986_v2 = vunpack.i.h.bf16 %v2984_v17  ;;  %v2985_v9 = vunpack.i.l.bf16 %v2984_v17 }
 0x49c   : > { %v2974_v56 = vpop.permute.xlu0 %2973 }
 0x49d   : > { %v2976_v54 = vunpack.i.h.bf16 %v2974_v56  ;;  %v2975_v57 = vunpack.i.l.bf16 %v2974_v56 }
 0x49f   : > { %v2243_v10 = vsel %vm1565_vm3, %v2158_v36, %v2975_v57  ;;  %v2244_v62 = vsel %vm1565_vm3, %v2212_v40, %v2976_v54  ;;  %v2301_v36 = vsub.f32 1.0, %v2300_v34  ;;  %v2992_v57 = vld [vmem:[%s619_s24] ss:$0 sm:$0xff] }
 0x4a0   : > { %v2246_v0 = vsel %vm2245_vm5, %v2243_v10, %v2980_v60  ;;  %v2247_v1 = vsel %vm2245_vm5, %v2244_v62, %v2981_v58 }
 0x4a1   : > { %v2249_v63 = vsel %vm2248_vm6, %v2246_v0, %v2985_v9  ;;  %v2250_v3 = vsel %vm2248_vm6, %v2247_v1, %v2986_v2  ;;  %v2302_v37 = vmul.f32 %v3030_v31, %v2301_v36  ;;  %v2822_v0 = vld [vmem:[%s3541_s25 + $0x18] sm:$0xff]  ;;  %v2821_v1 = vld [vmem:[%s3541_s25 + $0x10] sm:$0xff] }
 0x4a2   : > { %v2251_v6 = vpack.c.bf16 %v2250_v3, %v2249_v63  ;;  %2439 = vmatpush.bf16.msra.mxu3 %v2822_v0  ;;  %v2820_v63 = vld [vmem:[%s3541_s25 + $0x8] sm:$0xff]  ;;  %v2819_v3 = vld [vmem:[%s3541_s25] sm:$0xff] }
 0x4a3   : > { %v2303_v38 = vadd.f32 %v3030_v31, %v2302_v37 }
 0x4a4   : > { %2778 = vmatmul.msk.bf16.vlgmr.msra.gmra.mxu1 %vm782_vm1, %v2251_v6 }
 0x4a5   : > { %v4056_v39 = vsel %vm2304_vm7, %v3030_v31, %v2303_v38 }
 0x4a6   : > { %2440 = vmatpush.bf16.msra.mxu3 %v2821_v1 }
 0x4aa   : > { %2441 = vmatpush.bf16.msra.mxu3 %v2820_v63 }
 0x4ae   : > { %2442 = vmatpush.bf16.msra.mxu3 %v2819_v3 }
 0x521   : > { %v2284_v16 = vpop.f32.mrf.mxu1 }
 0x522   : > { %v2285_v18 = vadd.f32 %v2990_v7, %v2284_v16 }
 0x524   : > { %v2289_v20 = vadd.f32 %v3039_v19, %v2285_v18 }
 0x526   : > { %v2293_v14 = vsel %vm782_vm1, %v2289_v20, 0.0 }
 0x527   : > { %2294 = vadd.xlane.f32.xlu0 %v2293_v14 }
 0x529   : > { %v2286_v24 = vpop.f32.mrf.mxu1 }
 0x52a   : > { %v2287_v26 = vadd.f32 %v2990_v7, %v2286_v24  ;;  %v2993_v7 = vld [vmem:[%s736_s20] ss:$0 sm:$0xff] }
 0x52c   : > { %v2290_v55 = vadd.f32 %v3040_v27, %v2287_v26  ;;  %v2994_v26 = vld [vmem:[%s744_s0] ss:$0 sm:$0xff] }
 0x52e   : > { %v2296_v28 = vsel %vm782_vm1, %v2290_v55, 0.0 }
 0x52f   : > { %2297 = vadd.xlane.f32.xlu2 %v2296_v28 }
 0x59a   : > { %v2295_v61 = vpop.xlane.xlu0 %2294 }
 0x59b   : > { %v2306_v59 = vmul.f32 %v4056_v39, %v2295_v61 }
 0x59d   : > { %v2308_v30 = vsub.f32 %v2289_v20, %v2306_v59 }
 0x59f   : > { %v2310_v41 = vmul.f32 %v2308_v30, %v2308_v30 }
 0x5a1   : > { %v2312_v42 = vsel %vm782_vm1, %v2310_v41, 0.0 }
 0x5a2   : > { %v2298_v43 = vpop.xlane.xlu2 %2297  ;;  %2313 = vadd.xlane.f32.xlu1 %v2312_v42 }
 0x5a3   : > { %v2307_v44 = vmul.f32 %v4056_v39, %v2298_v43 }
 0x5a5   : > { %v2309_v45 = vsub.f32 %v2290_v55, %v2307_v44 }
 0x5a7   : > { %v2311_v5 = vmul.f32 %v2309_v45, %v2309_v45 }
 0x5a9   : > { %v2315_v4 = vsel %vm782_vm1, %v2311_v5, 0.0 }
 0x5aa   : > { %2316 = vadd.xlane.f32.xlu0 %v2315_v4 }
 0x615   : > { %v2314_v15 = vpop.xlane.xlu1 %2313 }
 0x616   : > { %v2318_v46 = vmul.f32 %v2314_v15, %v4056_v39 }
 0x618   : > { %v2320_v33 = vadd.f32 1e-05, %v2318_v46 }
 0x61a   : > { %3031 = vrsqrt.f32 %v2320_v33  ;;  %vm2328_vm9 = vweird.f32 %v2320_v33 }
 0x61d   : > { %v2317_v8 = vpop.xlane.xlu0 %2316 }
 0x61e   : > { %v2319_v49 = vmul.f32 %v2317_v8, %v4056_v39 }
 0x620   : > { %v3032_v21 = vpop.eup %3031  ;;  %v2321_v25 = vadd.f32 1e-05, %v2319_v49 }
 0x621   : > { %v2323_v50 = vmul.f32 %v3032_v21, %v2320_v33  ;;  %vm2329_vm8 = vweird.f32 %v3032_v21 }
 0x622   : > { %3033 = vrsqrt.f32 %v2321_v25  ;;  %vm2330_vm10 = vmor %vm2328_vm9, %vm2329_vm8  ;;  %vm2338_vm12 = vweird.f32 %v2321_v25 }
 0x623   : > { %v2324_v29 = vmul.f32 %v3032_v21, %v2323_v50 }
 0x625   : > { %v2325_v48 = vmul.f32 0.5, %v2324_v29 }
 0x627   : > { %v2326_v11 = vsub.f32 1.5, %v2325_v48 }
 0x628   : > { %v3034_v51 = vpop.eup %3033 }
 0x629   : > { %v2327_v52 = vmul.f32 %v3032_v21, %v2326_v11  ;;  %v2333_v12 = vmul.f32 %v3034_v51, %v2321_v25  ;;  %vm2339_vm11 = vweird.f32 %v3034_v51 }
 0x62a   : > { %vm2340_vm13 = vmor %vm2338_vm12, %vm2339_vm11 }
 0x62b   : > { %v2334_v53 = vmul.f32 %v3034_v51, %v2333_v12  ;;  %v2331_v40 = vsel %vm2330_vm10, %v3032_v21, %v2327_v52  ;;  %v2996_v12 = vld [vmem:[%s628_s11] ss:$0 sm:$0xff]  ;;  %s2519_s11 = sshll.u32 %s4186_s7, 4  ;;  %s2520_s11 = int_to_ptr.hbm [resolvable:$true] %s2519_s11 }
 0x62c   : > { %v2342_v17 = vmul.f32 %v2331_v40, %v2308_v30 }
 0x62d   : > { %v2335_v23 = vmul.f32 0.5, %v2334_v53 }
 0x62e   : > { %v2347_v58 = vmul.f32 %v2991_v32, %v2342_v17 }
 0x62f   : > { %v2336_v35 = vsub.f32 1.5, %v2335_v23 }
 0x630   : > { %v2352_v9 = vadd.f32 %v2992_v57, %v2347_v58 }
 0x631   : > { %v2337_v56 = vmul.f32 %v3034_v51, %v2336_v35 }
 0x633   : > { %v2341_v54 = vsel %vm2340_vm13, %v3034_v51, %v2337_v56  ;;  %v2995_v51 = vld [vmem:[%s747_s9] ss:$0 sm:$0xff]  ;;  %s2517_s9 = sshll.u32 %s3300_s15, 4  ;;  %s2518_s9 = int_to_ptr.vmem [resolvable:$true] %s2517_s9 }
 0x634   : > { %v2343_v60 = vmul.f32 %v2341_v54, %v2309_v45 }
 0x636   : > { %v2348_v2 = vmul.f32 %v2991_v32, %v2343_v60 }
 0x638   : > { %v2353_v10 = vadd.f32 %v2992_v57, %v2348_v2 }
 0x63a   : > { %v2354_v62 = vpack.c.bf16 %v2353_v10, %v2352_v9 }
 0x63c   : > { %2787 = vmatmul.msk.bf16.vlgmr.msra.gmra.mxu2 %vm782_vm1, %v2354_v62 }
 0x6bf   : > { %v2387_v6 = vpop.f32.mrf.mxu2 }
 0x6c0   : > { %v2388_v16 = vadd.f32 %v2993_v7, %v2387_v6 }
 0x6c2   : > { %v2392_v20 = vmax.f32 %v2388_v16, 0.0 }
 0x6c7   : > { %v2389_v18 = vpop.f32.mrf.mxu2 }
 0x6c8   : > { %v2390_v19 = vadd.f32 %v2993_v7, %v2389_v18 }
 0x6ca   : > { %v2393_v14 = vmax.f32 %v2390_v19, 0.0 }
 0x6cc   : > { %v2394_v24 = vpack.c.bf16 %v2393_v14, %v2392_v20 }
 0x6ce   : > { %2804 = vmatmul.msk.bf16.vlgmr.msra.gmra.mxu3 %vm2431_vm14, %v2394_v24 }
 0x751   : > { %v2444_v27 = vpop.f32.mrf.mxu3 }
 0x752   : > { %v2445_v55 = vadd.f32 %v2994_v26, %v2444_v27 }
 0x754   : > { %v2449_v28 = vadd.f32 %v2445_v55, %v2352_v9 }
 0x756   : > { %v2453_v13 = vsel %vm782_vm1, %v2449_v28, 0.0 }
 0x757   : > { %2454 = vadd.xlane.f32.xlu2 %v2453_v13 }
 0x759   : > { %v2446_v31 = vpop.f32.mrf.mxu3 }
 0x75a   : > { %v2447_v34 = vadd.f32 %v2994_v26, %v2446_v31 }
 0x75c   : > { %v2450_v36 = vadd.f32 %v2447_v34, %v2353_v10 }
 0x75e   : > { %v2456_v37 = vsel %vm782_vm1, %v2450_v36, 0.0 }
 0x75f   : > { %2457 = vadd.xlane.f32.xlu0 %v2456_v37 }
 0x7ca   : > { %v2455_v38 = vpop.xlane.xlu2 %2454 }
 0x7cb   : > { %v2459_v61 = vmul.f32 %v2455_v38, %v4056_v39 }
 0x7cd   : > { %v2461_v59 = vsub.f32 %v2449_v28, %v2459_v61 }
 0x7cf   : > { %v2463_v30 = vmul.f32 %v2461_v59, %v2461_v59 }
 0x7d1   : > { %v2465_v41 = vsel %vm782_vm1, %v2463_v30, 0.0 }
 0x7d2   : > { %v2458_v42 = vpop.xlane.xlu0 %2457  ;;  %2466 = vadd.xlane.f32.xlu1 %v2465_v41 }
 0x7d3   : > { %v2460_v43 = vmul.f32 %v2458_v42, %v4056_v39 }
 0x7d5   : > { %v2462_v44 = vsub.f32 %v2450_v36, %v2460_v43 }
 0x7d7   : > { %v2464_v45 = vmul.f32 %v2462_v44, %v2462_v44 }
 0x7d9   : > { %v2468_v5 = vsel %vm782_vm1, %v2464_v45, 0.0 }
 0x7da   : > { %2469 = vadd.xlane.f32.xlu2 %v2468_v5 }
 0x845   : > { %v2467_v4 = vpop.xlane.xlu1 %2466 }
 0x846   : > { %v2471_v15 = vmul.f32 %v2467_v4, %v4056_v39 }
 0x848   : > { %v2473_v46 = vadd.f32 1e-05, %v2471_v15 }
 0x84a   : > { %3035 = vrsqrt.f32 %v2473_v46  ;;  %vm2481_vm0 = vweird.f32 %v2473_v46 }
 0x84d   : > { %v2470_v33 = vpop.xlane.xlu2 %2469 }
 0x84e   : > { %v2472_v22 = vmul.f32 %v2470_v33, %v4056_v39 }
 0x850   : > { %v3036_v47 = vpop.eup %3035  ;;  %v2474_v8 = vadd.f32 1e-05, %v2472_v22 }
 0x851   : > { %v2476_v49 = vmul.f32 %v3036_v47, %v2473_v46  ;;  %vm2482_vm15 = vweird.f32 %v3036_v47 }
 0x852   : > { %3037 = vrsqrt.f32 %v2474_v8  ;;  %vm2483_vm2 = vmor %vm2481_vm0, %vm2482_vm15  ;;  %vm2491_vm4 = vweird.f32 %v2474_v8 }
 0x853   : > { %v2477_v21 = vmul.f32 %v3036_v47, %v2476_v49 }
 0x855   : > { %v2478_v25 = vmul.f32 0.5, %v2477_v21 }
 0x857   : > { %v2479_v50 = vsub.f32 1.5, %v2478_v25 }
 0x858   : > { %v3038_v29 = vpop.eup %3037 }
 0x859   : > { %v2480_v48 = vmul.f32 %v3036_v47, %v2479_v50  ;;  %v2486_v11 = vmul.f32 %v3038_v29, %v2474_v8  ;;  %vm2492_vm3 = vweird.f32 %v3038_v29 }
 0x85a   : > { %vm2493_vm5 = vmor %vm2491_vm4, %vm2492_vm3 }
 0x85b   : > { %v2484_v39 = vsel %vm2483_vm2, %v3036_v47, %v2480_v48  ;;  %v2487_v52 = vmul.f32 %v3038_v29, %v2486_v11 }
 0x85c   : > { %v2495_v53 = vmul.f32 %v2484_v39, %v2461_v59 }
 0x85d   : > { %v2488_v40 = vmul.f32 0.5, %v2487_v52 }
 0x85e   : > { %v2500_v23 = vmul.f32 %v2995_v51, %v2495_v53 }
 0x85f   : > { %v2489_v35 = vsub.f32 1.5, %v2488_v40 }
 0x860   : > { %v2505_v32 = vadd.f32 %v2996_v12, %v2500_v23 }
 0x861   : > { %v2490_v17 = vmul.f32 %v3038_v29, %v2489_v35 }
 0x862   : > { %2507 = vst.msk [vmem:[#allocation10] sm:$0xff] %vm782_vm1, %v2505_v32 }
 0x863   : > { %v2494_v56 = vsel %vm2493_vm5, %v3038_v29, %v2490_v17 }
 0x864   : > { %v2496_v54 = vmul.f32 %v2494_v56, %v2462_v44 }
 0x866   : > { %v2501_v57 = vmul.f32 %v2995_v51, %v2496_v54 }
 0x868   : > { %v2506_v58 = vadd.f32 %v2996_v12, %v2501_v57 }
 0x86a   : > { %2508 = vst.msk [vmem:[#allocation10 + $0x8] sm:$0xff] %vm782_vm1, %v2506_v58 }
 0x86b   : > { %2838 = dma.vmem_to_hbm [thread:$0]  (%p2863_p3), %s2518_s9, 256, %s2520_s11, [#allocation4], %s3301_s16, %s3301_s16, %s3298_s10  }
 0x86c   : > { %3256 = dma.done.wait (%p2863_p3), [#allocation4], 256  }
 0x86d   : > { %3258 = vsyncadd (%p2863_p3), [#allocation4], 4294967040 }
 0x86e PF: > { %s4187_s12 = sld [smem:[#allocation16_spill]]  ;;  %s4191_s29 = smov %s3265_s30 }
 0x86f   : > { %s4188_s22 = sld [smem:[#allocation15_spill]]  ;;  %s4193_s16 = smov %s3277_s17 }
 0x870   : > { %s4189_s15 = sld [smem:[#allocation18_spill]] }
 0x871   : > { %s4190_s14 = sld [smem:[#allocation17_spill]] }
 0x874   : > { %s27_s18 = sadd.s32 1, %s4187_s12  }
 0x875   : > { %p24_p4 = scmp.ge.s32.totalorder %s27_s18, 4   ;;  %s4192_s30 = smov %s4188_s22 }
 0x877   : > { %s4194_s17 = smov %s4190_s14  ;;  %26 = sbr.rel (!%p24_p4) target bundleno = 19 (0x13), region = 176 }
 0x87c   :  { %2536 = vsyncpa [#allocation3], 1 }
 0x87d   :  { %2538 = vsyncpa [#allocation3 + $0x1], 1 }
 0x87e   :  { %2539 = vsyncpa [#allocation6], 1 }
 0x87f   :  { %2540 = vsyncpa [#allocation4], 1 }
 0x880   :  { %2542 = vsyncpa [#allocation4 + $0x1], 1 }

</bundles_post_ra>
